<compile_context>
chip_gen: v7x
topology: tpu7x:2x2x1
jax: 0.10.0
libtpu: 0.0.40
codegen_flags: <defaults>
</compile_context>

<pallas_src>
import jax
import jax.numpy as jnp
from jax.experimental import pallas as pl
from jax.experimental.pallas import tpu as pltpu

HIDDEN = 1024


def _mlp_kernel(x_ref, w1_ref, b1_ref, w2_ref, b2_ref, w3t_ref, b3_ref, o_ref):
    # Layer 1: input_dim is tiny (typically 1) -> keep it off the MXU.
    x = x_ref[...]                                        # (B, D_in) f32
    if x.shape[1] == 1:
        # K=1 "matmul" is just a broadcast multiply on the VPU.
        h1 = x * w1_ref[...] + b1_ref[...]                # (B,1)*(1,H) -> (B,H)
    else:
        h1 = jnp.dot(x, w1_ref[...],
                     preferred_element_type=jnp.float32) + b1_ref[...]
    h1 = jnp.maximum(h1, 0.0)                             # relu
    # TODO(synk): PCLayer / PCDropout are identity in eval mode, so omitted.

    # Layer 2 on the MXU: bf16 inputs, f32 accumulate (single 1024x1024 block).
    h2 = jnp.dot(h1.astype(jnp.bfloat16), w2_ref[...],
                 preferred_element_type=jnp.float32) + b2_ref[...]   # (B, H)
    h2 = jnp.maximum(h2, 0.0)                             # relu

    # Layer 3 (N=1): VPU multiply + lane reduction; b3 is an SMEM scalar.
    y = jnp.sum(h2 * w3t_ref[...], axis=-1, keepdims=True) + b3_ref[0, 0]
    o_ref[...] = y.astype(o_ref.dtype)                    # (B, 1)


def pc_simple_regressor_forward(x, params):
    """Eval-mode forward pass of PCSimpleRegressor.

    x: (B, input_dim) float32
    params: dict with w1 (in,1024), b1 (1,1024), w2 (1024,1024), b2 (1,1024),
            w3 (1024,1), b3 (1,1)  -- weights already transposed to (in, out).
    """
    B, d_in = x.shape
    H = HIDDEN

    x = x.astype(jnp.float32)
    w1 = params["w1"].astype(jnp.float32)                  # (d_in, H) tiny -> f32
    b1 = params["b1"].astype(jnp.float32)                  # (1, H)
    w2 = params["w2"].astype(jnp.bfloat16)                 # (H, H) HBM-heavy -> bf16
    b2 = params["b2"].astype(jnp.float32)                  # (1, H)
    w3t = params["w3"].reshape(1, H).astype(jnp.float32)   # (1, H)
    b3 = params["b3"].reshape(1, 1).astype(jnp.float32)    # (1, 1) scalar -> SMEM

    flops = 2 * B * (d_in * H + H * H + H)
    bytes_accessed = (x.size * 4 + w1.size * 4 + b1.size * 4 + w2.size * 2
                      + b2.size * 4 + w3t.size * 4 + b3.size * 4 + B * 4)

    vmem = pltpu.MemorySpace.VMEM
    smem = pltpu.MemorySpace.SMEM

    return pl.pallas_call(
        _mlp_kernel,
        out_shape=jax.ShapeDtypeStruct((B, 1), jnp.float32),
        in_specs=[
            pl.BlockSpec(memory_space=vmem),   # x
            pl.BlockSpec(memory_space=vmem),   # w1
            pl.BlockSpec(memory_space=vmem),   # b1
            pl.BlockSpec(memory_space=vmem),   # w2 (whole 1024x1024 bf16, 2 MiB)
            pl.BlockSpec(memory_space=vmem),   # b2
            pl.BlockSpec(memory_space=vmem),   # w3^T
            pl.BlockSpec(memory_space=smem),   # b3 scalar
        ],
        out_specs=pl.BlockSpec(memory_space=vmem),
        compiler_params=pltpu.CompilerParams(
            vmem_limit_bytes=24 << 20,         # footprint is ~2.1 MiB; plenty of headroom
        ),
        cost_estimate=pl.CostEstimate(
            flops=flops, transcendentals=0, bytes_accessed=bytes_accessed),
    )(x, w1, b1, w2, b2, w3t, b3)


def init_params(key, input_dim=1, hidden=HIDDEN):
    """Deterministic init mimicking nn.Linear default (uniform +/- 1/sqrt(fan_in))."""
    ks = jax.random.split(key, 6)

    def lin(kw, kb, fan_in, fan_out):
        bound = 1.0 / jnp.sqrt(jnp.float32(fan_in))
        # stored transposed: (fan_in, fan_out) so kernel does x @ W
        w = jax.random.uniform(kw, (fan_in, fan_out), jnp.float32, -bound, bound)
        b = jax.random.uniform(kb, (1, fan_out), jnp.float32, -bound, bound)
        return w, b

    w1, b1 = lin(ks[0], ks[1], input_dim, hidden)
    w2, b2 = lin(ks[2], ks[3], hidden, hidden)
    w3, b3 = lin(ks[4], ks[5], hidden, 1)
    return {"w1": w1, "b1": b1, "w2": w2, "b2": b2, "w3": w3, "b3": b3}


if __name__ == "__main__":
    key = jax.random.PRNGKey(0)
    k_params, k_x = jax.random.split(key)

    input_dim = 1
    batch = 8
    params = init_params(k_params, input_dim=input_dim, hidden=HIDDEN)
    x = jax.random.normal(k_x, (batch, input_dim), dtype=jnp.float32)

    y = pc_simple_regressor_forward(x, params)
    y = jax.block_until_ready(y)

    # plain-JAX reference mimicking the kernel's numerics (bf16 W2 / bf16 h1
    # feed, f32 accumulation everywhere else).
    w2_q = params["w2"].astype(jnp.bfloat16).astype(jnp.float32)
    h1 = jnp.maximum(x * params["w1"] + params["b1"], 0.0)
    h1_q = h1.astype(jnp.bfloat16).astype(jnp.float32)
    h2 = jnp.maximum(h1_q @ w2_q + params["b2"], 0.0)
    y_ref = (jnp.sum(h2 * params["w3"].reshape(1, -1), axis=-1, keepdims=True)
             + params["b3"])

    assert y.shape == (batch, 1)
    assert jnp.allclose(y, y_ref, atol=2e-3, rtol=2e-3), (y, y_ref)

    print("KERNEL_OK")
</pallas_src>

<mosaic_0001>
module attributes {stable_mosaic.version = 11 : i64} {
  func.func @_mlp_kernel(%arg0: memref<8x1xf32, #tpu.memory_space<vmem>>, %arg1: memref<1x1024xf32, #tpu.memory_space<vmem>>, %arg2: memref<1x1024xf32, #tpu.memory_space<vmem>>, %arg3: memref<1024x1024xbf16, #tpu.memory_space<vmem>>, %arg4: memref<1x1024xf32, #tpu.memory_space<vmem>>, %arg5: memref<1x1024xf32, #tpu.memory_space<vmem>>, %arg6: memref<1x1xf32, #tpu.memory_space<smem>>, %arg7: memref<8x1xf32, #tpu.memory_space<vmem>>) attributes {dimension_semantics = [], scalar_prefetch = 0 : i64, scratch_operands = 0 : i64, tpu.core_type = #tpu.core_type<tc>} {
    %c0 = arith.constant 0 : index
    %c0_0 = arith.constant 0 : index
    %0 = vector.load %arg0[%c0, %c0_0] : memref<8x1xf32, #tpu.memory_space<vmem>>, vector<8x1xf32>
    %c0_1 = arith.constant 0 : index
    %c0_2 = arith.constant 0 : index
    %1 = vector.load %arg1[%c0_1, %c0_2] : memref<1x1024xf32, #tpu.memory_space<vmem>>, vector<1x1024xf32>
    %2 = vector.broadcast %0 : vector<8x1xf32> to vector<8x1024xf32>
    %3 = vector.broadcast %1 : vector<1x1024xf32> to vector<8x1024xf32>
    %4 = arith.mulf %2, %3 : vector<8x1024xf32>
    %c0_3 = arith.constant 0 : index
    %c0_4 = arith.constant 0 : index
    %5 = vector.load %arg2[%c0_3, %c0_4] : memref<1x1024xf32, #tpu.memory_space<vmem>>, vector<1x1024xf32>
    %6 = vector.broadcast %5 : vector<1x1024xf32> to vector<8x1024xf32>
    %7 = arith.addf %4, %6 : vector<8x1024xf32>
    %cst = arith.constant 0.000000e+00 : f32
    %8 = vector.broadcast %cst : f32 to vector<8x1024xf32>
    %9 = arith.maximumf %7, %8 : vector<8x1024xf32>
    %10 = arith.truncf %9 : vector<8x1024xf32> to vector<8x1024xbf16>
    %c0_5 = arith.constant 0 : index
    %c0_6 = arith.constant 0 : index
    %11 = vector.load %arg3[%c0_5, %c0_6] : memref<1024x1024xbf16, #tpu.memory_space<vmem>>, vector<1024x1024xbf16>
    %cst_7 = arith.constant dense<0.000000e+00> : vector<8x1024xf32>
    %12 = tpu.matmul %10, %11, %cst_7 {dimension_numbers = #tpu.dot_dimension_numbers<[1], [0], [0], [1], [0, 0, 1, 1], [], []>} : vector<8x1024xbf16>, vector<1024x1024xbf16>, vector<8x1024xf32> -> vector<8x1024xf32>
    %c0_8 = arith.constant 0 : index
    %c0_9 = arith.constant 0 : index
    %13 = vector.load %arg4[%c0_8, %c0_9] : memref<1x1024xf32, #tpu.memory_space<vmem>>, vector<1x1024xf32>
    %14 = vector.broadcast %13 : vector<1x1024xf32> to vector<8x1024xf32>
    %15 = arith.addf %12, %14 : vector<8x1024xf32>
    %cst_10 = arith.constant 0.000000e+00 : f32
    %16 = vector.broadcast %cst_10 : f32 to vector<8x1024xf32>
    %17 = arith.maximumf %15, %16 : vector<8x1024xf32>
    %c0_11 = arith.constant 0 : index
    %c0_12 = arith.constant 0 : index
    %18 = vector.load %arg5[%c0_11, %c0_12] : memref<1x1024xf32, #tpu.memory_space<vmem>>, vector<1x1024xf32>
    %19 = vector.broadcast %18 : vector<1x1024xf32> to vector<8x1024xf32>
    %20 = arith.mulf %17, %19 : vector<8x1024xf32>
    %cst_13 = arith.constant dense<0.000000e+00> : vector<8xf32>
    %21 = vector.multi_reduction <add>, %20, %cst_13 [1] : vector<8x1024xf32> to vector<8xf32>
    %22 = vector.shape_cast %21 : vector<8xf32> to vector<8x1xf32>
    %c0_14 = arith.constant 0 : index
    %c0_15 = arith.constant 0 : index
    %23 = memref.load %arg6[%c0_14, %c0_15] : memref<1x1xf32, #tpu.memory_space<smem>>
    %24 = vector.broadcast %23 : f32 to vector<8x1xf32>
    %25 = arith.addf %22, %24 : vector<8x1xf32>
    %c0_16 = arith.constant 0 : index
    %c0_17 = arith.constant 0 : index
    %26 = vector.load %arg7[%c0_16, %c0_17] : memref<8x1xf32, #tpu.memory_space<vmem>>, vector<8x1xf32>
    tpu.vector_store %arg7[%c0_16, %c0_17], %25 {strides = array<i32>} : memref<8x1xf32, #tpu.memory_space<vmem>>, vector<8x1xf32>,
    return
  }
}

</mosaic_0001>

<bundles_post_ra>
// kernel: tpu_custom_call.1
= control target key start
LH: loop header
LB: loop body
LE: loop exit
PB: predicated region body
PF: predicated region fallthrough
CT: control target
= control target key end

     0   :  { %13 = vsyncpa [#allocation4], 0  ;;  %s5031_s0 = inlined_call_operand.vmem [shape: f32[8,1], index: 0, kind: input, shape index: {}]   ;;  %s5032_s1 = inlined_call_operand.hbm [shape: f32[1,1024], index: 1, kind: input, shape index: {}]   ;;  %s5033_s2 = inlined_call_operand.hbm [shape: f32[1,1024], index: 2, kind: input, shape index: {}]   ;;  %s5034_s3 = inlined_call_operand.hbm [shape: bf16[1024,1024], index: 3, kind: input, shape index: {}]   ;;  %s5035_s4 = inlined_call_operand.hbm [shape: f32[1,1024], index: 4, kind: input, shape index: {}]   ;;  %s5036_s5 = inlined_call_operand.hbm [shape: f32[1,1024], index: 5, kind: input, shape index: {}]   ;;  %s5037_s6 = inlined_call_operand.<no memory space> [shape: f32[1,1], index: 6, kind: input, shape index: {}]   ;;  %s5038_s7 = inlined_call_operand.vmem [shape: f32[8,1], index: 7, kind: output, shape index: {}]  }
   0x1   :  { %14 = vsyncpa [#allocation6], 0 }
   0x2   :  { %15 = vsyncpa [#allocation9], 0  ;;  %s4751_s24 = smov [#allocation5]   ;;  %s4752_s26 = smov [#allocation8]  }
   0x3   :  { %s34_s25 = sshll.u32 %s4751_s24, 4  ;;  %s56_s27 = sshll.u32 %s4752_s26, 4  ;;  %s35_s25 = int_to_ptr.vmem [resolvable:$true] %s34_s25  ;;  %s57_s27 = int_to_ptr.vmem [resolvable:$true] %s56_s27 }
   0x4   :  { %s4635_s30 = scalar_lea.hbm %s5033_s2, 128 }
   0x5   :  { %p4636_p0 = scmp.ne.s32.totalorder %s5033_s2, %s4635_s30  ;;  %p4639_p1 = scmp.lt.u32.totalorder %s4635_s30, %s5033_s2 }
   0x7   :  { %p4641_p2 = pnand %p4639_p1, %p4636_p0 }
   0x9   :  { %4644 = shalt.err (!%p4641_p2)
}
   0xa   :  { %s4645_s12 = scalar_lea.vmem %s35_s25, 128  ;;  %p4650_p4 = scmp.lt.s32.totalorder %s35_s25, %s35_s25 }
   0xb   :  { %p4646_p3 = scmp.ne.s32.totalorder %s35_s25, %s4645_s12  ;;  %p4651_p5 = scmp.lt.s32.totalorder %s4645_s12, %s4645_s12 }
   0xd   :  { %p4652_p6 = por %p4651_p5, %p4650_p4 }
   0xf   :  { %p4653_p7 = pnand %p4652_p6, %p4646_p3 }
  0x11   :  { %4656 = shalt.err (!%p4653_p7)
}
  0x12   :  { %37 = dma.hbm_to_vmem [thread:$0]  %s5033_s2, 128, %s35_s25, [#allocation6]  }
  0x13   :  { %s4657_s17 = scalar_lea.hbm %s5035_s4, 128 }
  0x14   :  { %p4658_p8 = scmp.ne.s32.totalorder %s5035_s4, %s4657_s17  ;;  %p4661_p9 = scmp.lt.u32.totalorder %s4657_s17, %s5035_s4 }
  0x16   :  { %p4663_p10 = pnand %p4661_p9, %p4658_p8 }
  0x18   :  { %4666 = shalt.err (!%p4663_p10)
}
  0x19   :  { %s4667_s22 = scalar_lea.vmem %s57_s27, 128  ;;  %p4672_p12 = scmp.lt.s32.totalorder %s57_s27, %s57_s27 }
  0x1a   :  { %p4668_p11 = scmp.ne.s32.totalorder %s57_s27, %s4667_s22  ;;  %p4673_p13 = scmp.lt.s32.totalorder %s4667_s22, %s4667_s22 }
  0x1c   :  { %p4674_p0 = por %p4673_p13, %p4672_p12 }
  0x1e   :  { %p4675_p1 = pnand %p4674_p0, %p4668_p11 }
  0x20   :  { %4678 = shalt.err (!%p4675_p1)
}
  0x21   :  { %59 = dma.hbm_to_vmem [thread:$0]  %s5035_s4, 128, %s57_s27, [#allocation9]  }
  0x22   :  { %s4753_s24 = smov [#allocation3]   ;;  %s4754_s26 = smov [#allocation7]  }
  0x23   :  { %s24_s25 = sshll.u32 %s4753_s24, 4  ;;  %s43_s28 = sshll.u32 %s4754_s26, 4  ;;  %s25_s25 = int_to_ptr.vmem [resolvable:$true] %s24_s25  ;;  %s4823_s28 = int_to_ptr.vmem [resolvable:$true] %s43_s28 }
  0x24   :  { %s4679_s8 = scalar_lea.hbm %s5032_s1, 128 }
  0x25   :  { %p4680_p2 = scmp.ne.s32.totalorder %s5032_s1, %s4679_s8  ;;  %p4683_p3 = scmp.lt.u32.totalorder %s4679_s8, %s5032_s1 }
  0x27   :  { %p4685_p4 = pnand %p4683_p3, %p4680_p2 }
  0x29   :  { %4688 = shalt.err (!%p4685_p4)
}
  0x2a   :  { %s4689_s4 = scalar_lea.vmem %s25_s25, 128  ;;  %p4694_p6 = scmp.lt.s32.totalorder %s25_s25, %s25_s25 }
  0x2b   :  { %p4690_p5 = scmp.ne.s32.totalorder %s25_s25, %s4689_s4  ;;  %p4695_p7 = scmp.lt.s32.totalorder %s4689_s4, %s4689_s4 }
  0x2d   :  { %p4696_p8 = por %p4695_p7, %p4694_p6 }
  0x2f   :  { %p4697_p9 = pnand %p4696_p8, %p4690_p5 }
  0x31   :  { %4700 = shalt.err (!%p4697_p9)
}
  0x32   :  { %27 = dma.hbm_to_vmem [thread:$0]  %s5032_s1, 128, %s25_s25, [#allocation4]  }
  0x33   :  { %s4701_s16 = scalar_lea.hbm %s5034_s3, 65536 }
  0x34   :  { %p4702_p10 = scmp.ne.s32.totalorder %s5034_s3, %s4701_s16  ;;  %p4705_p11 = scmp.lt.u32.totalorder %s4701_s16, %s5034_s3 }
  0x36   :  { %p4707_p12 = pnand %p4705_p11, %p4702_p10 }
  0x38   :  { %4710 = shalt.err (!%p4707_p12)
}
  0x39   :  { %s4711_s21 = scalar_lea.vmem %s4823_s28, 65536  ;;  %p4716_p0 = scmp.lt.s32.totalorder %s4823_s28, %s4823_s28 }
  0x3a   :  { %p4712_p13 = scmp.ne.s32.totalorder %s4823_s28, %s4711_s21  ;;  %p4717_p1 = scmp.lt.s32.totalorder %s4711_s21, %s4711_s21 }
  0x3c   :  { %p4718_p2 = por %p4717_p1, %p4716_p0 }
  0x3e   :  { %p4719_p3 = pnand %p4718_p2, %p4712_p13 }
  0x40   :  { %4722 = shalt.err (!%p4719_p3)
}
  0x41   :  { %s4755_s1 = smov 512   ;;  %s4756_s22 = smov 32  }
  0x42   :  { %49 = dma.hbm_to_vmem [thread:$0]  %s5034_s3, 65536, %s4823_s28, [#allocation6], %s4755_s1, %s4755_s1, %s4756_s22  }
  0x43   :  { %s4757_s24 = smov [#allocation10]   ;;  %s4723_s30 = scalar_lea.hbm %s5036_s5, 128 }
  0x44   :  { %s66_s25 = sshll.u32 %s4757_s24, 4  ;;  %p4724_p4 = scmp.ne.s32.totalorder %s5036_s5, %s4723_s30  ;;  %s67_s25 = int_to_ptr.vmem [resolvable:$true] %s66_s25 }
  0x45   :  { %p4727_p5 = scmp.lt.u32.totalorder %s4723_s30, %s5036_s5 }
  0x47   :  { %p4729_p6 = pnand %p4727_p5, %p4724_p4 }
  0x49   :  { %4732 = shalt.err (!%p4729_p6)
}
  0x4a   :  { %s4733_s12 = scalar_lea.vmem %s67_s25, 128  ;;  %p4738_p8 = scmp.lt.s32.totalorder %s67_s25, %s67_s25 }
  0x4b   :  { %p4734_p7 = scmp.ne.s32.totalorder %s67_s25, %s4733_s12  ;;  %p4739_p9 = scmp.lt.s32.totalorder %s4733_s12, %s4733_s12 }
  0x4d   :  { %p4740_p10 = por %p4739_p9, %p4738_p8 }
  0x4f   :  { %p4741_p11 = pnand %p4740_p10, %p4734_p7 }
  0x51   :  { %4744 = shalt.err (!%p4741_p11)
}
  0x52   :  { %69 = dma.hbm_to_vmem [thread:$0]  %s5036_s5, 128, %s67_s25, [#allocation9]  }
  0x53   :  { %4745 = dma.done.wait [#allocation4], 128  }
  0x54   :  { %4746 = vsyncadd [#allocation4], 4294967168 }
  0x55   :  { %4747 = dma.done.wait [#allocation6], 65664  }
  0x56   :  { %4748 = vsyncadd [#allocation6], 4294901632 }
  0x57   :  { %4749 = dma.done.wait [#allocation9], 256  }
  0x58   :  { %4750 = vsyncadd [#allocation9], 4294967040  ;;  %v4758_v0 = vmov 0   ;;  %v87_v1 = vld [vmem:[%s5031_s0] sm:$0xff]  ;;  %v209_v2 = vld [vmem:[#allocation7] sm:$0xff]  ;;  %vm4049_vm0 = vcmask 7168  }
  0x59   :  { %4634 = vset.pattern.permute.xlu0 %v4758_v0  ;;  %v213_v3 = vld [vmem:[#allocation7 + $0x20] sm:$0xff]  ;;  %v210_v5 = vld [vmem:[#allocation7 + $0x8] sm:$0xff] }
  0x5a   :  { %91 = vperm.xlu0 %4634, %v87_v1   ;;  %v4059_v4 = vcombine.high %v209_v2, %v213_v3  ;;  %v214_v6 = vld [vmem:[#allocation7 + $0x28] sm:$0xff]  ;;  %v4058_v7 = vcombine.low %v209_v2, %v213_v3  ;;  %v217_v8 = vld [vmem:[#allocation7 + $0x40] sm:$0xff] }
  0x5b   :  { %v4061_v9 = vcombine.high %v210_v5, %v214_v6  ;;  %v4060_v10 = vcombine.low %v210_v5, %v214_v6  ;;  %v221_v11 = vld [vmem:[#allocation7 + $0x60] sm:$0xff]  ;;  %v218_v12 = vld [vmem:[#allocation7 + $0x48] sm:$0xff] }
  0x5c   :  { %v222_v13 = vld [vmem:[#allocation7 + $0x68] sm:$0xff]  ;;  %3323 = vmatprep.subr.bf16.mxu0 %v4059_v4  ;;  %v4067_v14 = vcombine.high %v217_v8, %v221_v11  ;;  %v225_v16 = vld [vmem:[#allocation7 + $0x80] sm:$0xff]  ;;  %v4066_v19 = vcombine.low %v217_v8, %v221_v11 }
  0x5d   :  { %v4069_v15 = vcombine.high %v218_v12, %v222_v13  ;;  %v229_v17 = vld [vmem:[#allocation7 + $0xa0] sm:$0xff]  ;;  %v226_v18 = vld [vmem:[#allocation7 + $0x88] sm:$0xff]  ;;  %3487 = vmatprep.subr.bf16.mxu1 %v4061_v9  ;;  %3324 = vmatpush1.bf16.msra.mxu0 %v4058_v7  ;;  %v4068_v21 = vcombine.low %v218_v12, %v222_v13 }
  0x5e   :  { %v230_v20 = vld [vmem:[#allocation7 + $0xa8] sm:$0xff]  ;;  %3488 = vmatpush1.bf16.msra.mxu1 %v4060_v10  ;;  %3325 = vmatprep.subr.bf16.mxu0 %v4067_v14  ;;  %v4075_v22 = vcombine.high %v225_v16, %v229_v17  ;;  %v233_v24 = vld [vmem:[#allocation7 + $0xc0] sm:$0xff]  ;;  %v4074_v28 = vcombine.low %v225_v16, %v229_v17 }
  0x5f   :  { %3489 = vmatprep.subr.bf16.mxu1 %v4069_v15  ;;  %v4077_v23 = vcombine.high %v226_v18, %v230_v20  ;;  %v237_v25 = vld [vmem:[#allocation7 + $0xe0] sm:$0xff]  ;;  %v234_v26 = vld [vmem:[#allocation7 + $0xc8] sm:$0xff]  ;;  %v4076_v29 = vcombine.low %v226_v18, %v230_v20 }
  0x60   :  { %v238_v27 = vld [vmem:[#allocation7 + $0xe8] sm:$0xff]  ;;  %v4083_v30 = vcombine.high %v233_v24, %v237_v25  ;;  %v241_v32 = vld [vmem:[#allocation7 + $0x100] sm:$0xff]  ;;  %v4082_v36 = vcombine.low %v233_v24, %v237_v25 }
  0x61   :  { %3326 = vmatpush1.bf16.msra.mxu0 %v4066_v19  ;;  %v4085_v31 = vcombine.high %v234_v26, %v238_v27  ;;  %v245_v33 = vld [vmem:[#allocation7 + $0x120] sm:$0xff]  ;;  %v242_v34 = vld [vmem:[#allocation7 + $0x108] sm:$0xff]  ;;  %v4084_v37 = vcombine.low %v234_v26, %v238_v27 }
  0x62   :  { %3490 = vmatpush1.bf16.msra.mxu1 %v4068_v21  ;;  %3327 = vmatprep.subr.bf16.mxu0 %v4075_v22  ;;  %v246_v35 = vld [vmem:[#allocation7 + $0x128] sm:$0xff]  ;;  %v4091_v38 = vcombine.high %v241_v32, %v245_v33  ;;  %v249_v40 = vld [vmem:[#allocation7 + $0x140] sm:$0xff]  ;;  %v4090_v44 = vcombine.low %v241_v32, %v245_v33 }
  0x63   :  { %3491 = vmatprep.subr.bf16.mxu1 %v4077_v23  ;;  %v4093_v39 = vcombine.high %v242_v34, %v246_v35  ;;  %v253_v41 = vld [vmem:[#allocation7 + $0x160] sm:$0xff]  ;;  %v250_v42 = vld [vmem:[#allocation7 + $0x148] sm:$0xff]  ;;  %v4092_v45 = vcombine.low %v242_v34, %v246_v35 }
  0x64   :  { %v254_v43 = vld [vmem:[#allocation7 + $0x168] sm:$0xff]  ;;  %v4099_v46 = vcombine.high %v249_v40, %v253_v41  ;;  %v257_v48 = vld [vmem:[#allocation7 + $0x180] sm:$0xff]  ;;  %v4098_v52 = vcombine.low %v249_v40, %v253_v41 }
  0x65   :  { %3328 = vmatpush1.bf16.msra.mxu0 %v4074_v28  ;;  %v4101_v47 = vcombine.high %v250_v42, %v254_v43  ;;  %v261_v49 = vld [vmem:[#allocation7 + $0x1a0] sm:$0xff]  ;;  %v258_v50 = vld [vmem:[#allocation7 + $0x188] sm:$0xff]  ;;  %v4100_v53 = vcombine.low %v250_v42, %v254_v43 }
  0x66   :  { %3492 = vmatpush1.bf16.msra.mxu1 %v4076_v29  ;;  %3329 = vmatprep.subr.bf16.mxu0 %v4083_v30  ;;  %v262_v51 = vld [vmem:[#allocation7 + $0x1a8] sm:$0xff]  ;;  %v4107_v54 = vcombine.high %v257_v48, %v261_v49  ;;  %v265_v55 = vld [vmem:[#allocation7 + $0x1c0] sm:$0xff]  ;;  %v4106_v1 = vcombine.low %v257_v48, %v261_v49 }
  0x67   :  { %3493 = vmatprep.subr.bf16.mxu1 %v4085_v31  ;;  %v269_v56 = vld [vmem:[#allocation7 + $0x1e0] sm:$0xff]  ;;  %v4109_v57 = vcombine.high %v258_v50, %v262_v51  ;;  %v266_v58 = vld [vmem:[#allocation7 + $0x1c8] sm:$0xff]  ;;  %v4108_v3 = vcombine.low %v258_v50, %v262_v51 }
  0x68   :  { %v4869_v59 = vld [vmem:[#allocation7 + $0x400] sm:$0xff]  ;;  %v270_v61 = vld [vmem:[#allocation7 + $0x1e8] sm:$0xff]  ;;  %v4115_v4 = vcombine.high %v265_v55, %v269_v56  ;;  %v4114_v10 = vcombine.low %v265_v55, %v269_v56 }
  0x69   :  { %3330 = vmatpush1.bf16.msra.mxu0 %v4082_v36  ;;  %v4871_v60 = vld [vmem:[#allocation7 + $0x420] sm:$0xff]  ;;  %v4875_v63 = vld [vmem:[#allocation7 + $0x408] sm:$0xff]  ;;  %v4117_v5 = vcombine.high %v266_v58, %v270_v61  ;;  %v4116_v11 = vcombine.low %v266_v58, %v270_v61 }
  0x6a   :  { %3494 = vmatpush1.bf16.msra.mxu1 %v4084_v37  ;;  %3331 = vmatprep.subr.bf16.mxu0 %v4091_v38  ;;  %v4186_v62 = vcombine.low %v4869_v59, %v4871_v60  ;;  %v4877_v0 = vld [vmem:[#allocation7 + $0x428] sm:$0xff]  ;;  %v273_v6 = vld [vmem:[#allocation7 + $0x200] sm:$0xff] }
  0x6b   :  { %3495 = vmatprep.subr.bf16.mxu1 %v4093_v39  ;;  %v4188_v2 = vcombine.low %v4875_v63, %v4877_v0  ;;  %v277_v7 = vld [vmem:[#allocation7 + $0x220] sm:$0xff]  ;;  %v274_v8 = vld [vmem:[#allocation7 + $0x208] sm:$0xff] }
  0x6c   :  { %v278_v9 = vld [vmem:[#allocation7 + $0x228] sm:$0xff]  ;;  %v4123_v12 = vcombine.high %v273_v6, %v277_v7  ;;  %v281_v14 = vld [vmem:[#allocation7 + $0x240] sm:$0xff]  ;;  %v4122_v18 = vcombine.low %v273_v6, %v277_v7 }
  0x6d   :  { %3332 = vmatpush1.bf16.msra.mxu0 %v4090_v44  ;;  %v4125_v13 = vcombine.high %v274_v8, %v278_v9  ;;  %v285_v15 = vld [vmem:[#allocation7 + $0x260] sm:$0xff]  ;;  %v282_v16 = vld [vmem:[#allocation7 + $0x248] sm:$0xff]  ;;  %v4124_v19 = vcombine.low %v274_v8, %v278_v9 }
  0x6e   :  { %3496 = vmatpush1.bf16.msra.mxu1 %v4092_v45  ;;  %3333 = vmatprep.subr.bf16.mxu0 %v4099_v46  ;;  %v286_v17 = vld [vmem:[#allocation7 + $0x268] sm:$0xff]  ;;  %v4131_v20 = vcombine.high %v281_v14, %v285_v15  ;;  %v289_v22 = vld [vmem:[#allocation7 + $0x280] sm:$0xff]  ;;  %v4130_v26 = vcombine.low %v281_v14, %v285_v15  ;;  %v4187_v14 = vcombine.high %v4869_v59, %v4871_v60 }
  0x6f   :  { %3497 = vmatprep.subr.bf16.mxu1 %v4101_v47  ;;  %v4133_v21 = vcombine.high %v282_v16, %v286_v17  ;;  %v293_v23 = vld [vmem:[#allocation7 + $0x2a0] sm:$0xff]  ;;  %v290_v24 = vld [vmem:[#allocation7 + $0x288] sm:$0xff]  ;;  %v4132_v27 = vcombine.low %v282_v16, %v286_v17  ;;  %v4189_v15 = vcombine.high %v4875_v63, %v4877_v0  ;;  %v95_v16 = vlaneseq }
  0x70   :  { %v294_v25 = vld [vmem:[#allocation7 + $0x2a8] sm:$0xff]  ;;  %v4139_v28 = vcombine.high %v289_v22, %v293_v23  ;;  %v297_v30 = vld [vmem:[#allocation7 + $0x2c0] sm:$0xff]  ;;  %v4138_v34 = vcombine.low %v289_v22, %v293_v23  ;;  %v88_v22 = vld [vmem:[#allocation3] sm:$0xff] }
  0x71   :  { %3334 = vmatpush1.bf16.msra.mxu0 %v4098_v52  ;;  %v4141_v29 = vcombine.high %v290_v24, %v294_v25  ;;  %v301_v31 = vld [vmem:[#allocation7 + $0x2e0] sm:$0xff]  ;;  %v298_v32 = vld [vmem:[#allocation7 + $0x2c8] sm:$0xff]  ;;  %v4140_v35 = vcombine.low %v290_v24, %v294_v25  ;;  %v96_v17 = vshrl.u32 %v95_v16, 7  ;;  %v143_v24 = vld [vmem:[#allocation5] sm:$0xff] }
  0x72   :  { %3498 = vmatpush1.bf16.msra.mxu1 %v4100_v53  ;;  %3335 = vmatprep.subr.bf16.mxu0 %v4107_v54  ;;  %v302_v33 = vld [vmem:[#allocation7 + $0x2e8] sm:$0xff]  ;;  %v4147_v36 = vcombine.high %v297_v30, %v301_v31  ;;  %v305_v38 = vld [vmem:[#allocation7 + $0x300] sm:$0xff]  ;;  %v4146_v42 = vcombine.low %v297_v30, %v301_v31 }
  0x73   :  { %3499 = vmatprep.subr.bf16.mxu1 %v4109_v57  ;;  %v4149_v37 = vcombine.high %v298_v32, %v302_v33  ;;  %v309_v39 = vld [vmem:[#allocation7 + $0x320] sm:$0xff]  ;;  %v306_v40 = vld [vmem:[#allocation7 + $0x308] sm:$0xff]  ;;  %v4148_v43 = vcombine.low %v298_v32, %v302_v33  ;;  %v4893_v23 = vsub.s32 5, %v96_v17  ;;  %v4895_v25 = vsub.s32 4, %v96_v17 }
  0x74   :  { %v310_v41 = vld [vmem:[#allocation7 + $0x328] sm:$0xff]  ;;  %v4155_v44 = vcombine.high %v305_v38, %v309_v39  ;;  %v313_v46 = vld [vmem:[#allocation7 + $0x340] sm:$0xff]  ;;  %v4154_v50 = vcombine.low %v305_v38, %v309_v39 }
  0x75   :  { %3336 = vmatpush1.bf16.msra.mxu0 %v4106_v1  ;;  %v4157_v45 = vcombine.high %v306_v40, %v310_v41  ;;  %v317_v47 = vld [vmem:[#allocation7 + $0x360] sm:$0xff]  ;;  %v314_v48 = vld [vmem:[#allocation7 + $0x348] sm:$0xff]  ;;  %v4156_v51 = vcombine.low %v306_v40, %v310_v41  ;;  %v118_v31 = vrot.slane %v88_v22, %v4893_v23  ;;  %v114_v38 = vrot.slane %v88_v22, %v4895_v25 }
  0x76   :  { %3500 = vmatpush1.bf16.msra.mxu1 %v4108_v3  ;;  %3337 = vmatprep.subr.bf16.mxu0 %v4115_v4  ;;  %v318_v49 = vld [vmem:[#allocation7 + $0x368] sm:$0xff]  ;;  %v4163_v52 = vcombine.high %v313_v46, %v317_v47  ;;  %v321_v54 = vld [vmem:[#allocation7 + $0x380] sm:$0xff]  ;;  %v4162_v58 = vcombine.low %v313_v46, %v317_v47  ;;  %v4911_v40 = vsub.s32 6, %v96_v17  ;;  %v164_v46 = vrot.slane %v143_v24, %v4895_v25 }
  0x77   :  { %3501 = vmatprep.subr.bf16.mxu1 %v4117_v5  ;;  %v4165_v53 = vcombine.high %v314_v48, %v318_v49  ;;  %v325_v55 = vld [vmem:[#allocation7 + $0x3a0] sm:$0xff]  ;;  %v322_v56 = vld [vmem:[#allocation7 + $0x388] sm:$0xff]  ;;  %v4164_v61 = vcombine.low %v314_v48, %v318_v49 }
  0x78   :  { %v326_v57 = vld [vmem:[#allocation7 + $0x3a8] sm:$0xff]  ;;  %v4171_v1 = vcombine.high %v321_v54, %v325_v55  ;;  %v329_v4 = vld [vmem:[#allocation7 + $0x3c0] sm:$0xff]  ;;  %v4170_v8 = vcombine.low %v321_v54, %v325_v55 }
  0x79   :  { %3338 = vmatpush1.bf16.msra.mxu0 %v4114_v10  ;;  %v4173_v3 = vcombine.high %v322_v56, %v326_v57  ;;  %v333_v5 = vld [vmem:[#allocation7 + $0x3e0] sm:$0xff]  ;;  %v330_v6 = vld [vmem:[#allocation7 + $0x3c8] sm:$0xff]  ;;  %v4172_v9 = vcombine.low %v322_v56, %v326_v57 }
  0x7a   :  { %3502 = vmatpush1.bf16.msra.mxu1 %v4116_v11  ;;  %3339 = vmatprep.subr.bf16.mxu0 %v4123_v12  ;;  %v334_v7 = vld [vmem:[#allocation7 + $0x3e8] sm:$0xff]  ;;  %v4179_v10 = vcombine.high %v329_v4, %v333_v5  ;;  %v4178_v12 = vcombine.low %v329_v4, %v333_v5  ;;  %v345_v57 = vld [vmem:[#allocation7 + $0x440] sm:$0xff] }
  0x7b   :  { %3503 = vmatprep.subr.bf16.mxu1 %v4125_v13  ;;  %v4181_v11 = vcombine.high %v330_v6, %v334_v7  ;;  %v4180_v13 = vcombine.low %v330_v6, %v334_v7  ;;  %v350_v4 = vld [vmem:[#allocation7 + $0x468] sm:$0xff]  ;;  %v172_v7 = vrot.slane %v143_v24, %v4911_v40 }
  0x7c   :  { %v362_v59 = vld [vmem:[#allocation7 + $0x4c8] sm:$0xff] }
  0x7d   :  { %3340 = vmatpush1.bf16.msra.mxu0 %v4122_v18  ;;  %v4885_v18 = vsub.s32 1, %v96_v17  ;;  %v366_v60 = vld [vmem:[#allocation7 + $0x4e8] sm:$0xff] }
  0x7e   :  { %3504 = vmatpush1.bf16.msra.mxu1 %v4124_v19  ;;  %3341 = vmatprep.subr.bf16.mxu0 %v4131_v20  ;;  %v4887_v19 = vsub.s32 0, %v96_v17  ;;  %v4889_v20 = vsub.s32 3, %v96_v17 }
  0x7f   :  { %3505 = vmatprep.subr.bf16.mxu1 %v4133_v21  ;;  %v4891_v21 = vsub.s32 2, %v96_v17  ;;  %v152_v32 = vrot.slane %v143_v24, %v4885_v18 }
  0x80   :  { %v148_v33 = vrot.slane %v143_v24, %v4887_v19 }
  0x81   :  { %3342 = vmatpush1.bf16.msra.mxu0 %v4130_v26  ;;  %v4897_v26 = vsub.s32 7, %v96_v17  ;;  %v106_v30 = vrot.slane %v88_v22, %v4891_v21 }
  0x82   :  { %3506 = vmatpush1.bf16.msra.mxu1 %v4132_v27  ;;  %3343 = vmatprep.subr.bf16.mxu0 %v4139_v28  ;;  %v102_v27 = vrot.slane %v88_v22, %v4885_v18  ;;  %v98_v28 = vrot.slane %v88_v22, %v4887_v19 }
  0x83   :  { %3507 = vmatprep.subr.bf16.mxu1 %v4141_v29  ;;  %v110_v29 = vrot.slane %v88_v22, %v4889_v20  ;;  %v126_v39 = vrot.slane %v88_v22, %v4897_v26  ;;  %v176_v54 = vrot.slane %v143_v24, %v4897_v26 }
  0x85   :  { %3344 = vmatpush1.bf16.msra.mxu0 %v4138_v34  ;;  %v160_v34 = vrot.slane %v143_v24, %v4889_v20 }
  0x86   :  { %3508 = vmatpush1.bf16.msra.mxu1 %v4140_v35  ;;  %3345 = vmatprep.subr.bf16.mxu0 %v4147_v36  ;;  %v156_v35 = vrot.slane %v143_v24, %v4891_v21 }
  0x87   :  { %3509 = vmatprep.subr.bf16.mxu1 %v4149_v37  ;;  %v168_v37 = vrot.slane %v143_v24, %v4893_v23 }
  0x89   :  { %3346 = vmatpush1.bf16.msra.mxu0 %v4146_v42 }
  0x8a   :  { %3510 = vmatpush1.bf16.msra.mxu1 %v4148_v43  ;;  %3347 = vmatprep.subr.bf16.mxu0 %v4155_v44 }
  0x8b   :  { %3511 = vmatprep.subr.bf16.mxu1 %v4157_v45 }
  0x8d   :  { %3348 = vmatpush1.bf16.msra.mxu0 %v4154_v50 }
  0x8e   :  { %3512 = vmatpush1.bf16.msra.mxu1 %v4156_v51  ;;  %3349 = vmatprep.subr.bf16.mxu0 %v4163_v52 }
  0x8f   :  { %3513 = vmatprep.subr.bf16.mxu1 %v4165_v53 }
  0x91   :  { %3350 = vmatpush1.bf16.msra.mxu0 %v4162_v58  ;;  %v122_v58 = vrot.slane %v88_v22, %v4911_v40 }
  0x92   :  { %3514 = vmatpush1.bf16.msra.mxu1 %v4164_v61  ;;  %3351 = vmatprep.subr.bf16.mxu0 %v4171_v1  ;;  %v349_v1 = vld [vmem:[#allocation7 + $0x460] sm:$0xff] }
  0x93   :  { %3515 = vmatprep.subr.bf16.mxu1 %v4173_v3  ;;  %v346_v3 = vld [vmem:[#allocation7 + $0x448] sm:$0xff]  ;;  %v4194_v22 = vcombine.low %v345_v57, %v349_v1 }
  0x94   :  { %v4196_v24 = vcombine.low %v346_v3, %v350_v4 }
  0x95   :  { %3352 = vmatpush1.bf16.msra.mxu0 %v4170_v8  ;;  %v353_v8 = vld [vmem:[#allocation7 + $0x480] sm:$0xff] }
  0x96   :  { %3516 = vmatpush1.bf16.msra.mxu1 %v4172_v9  ;;  %3353 = vmatprep.subr.bf16.mxu0 %v4179_v10 }
  0x97   :  { %3517 = vmatprep.subr.bf16.mxu1 %v4181_v11  ;;  %v4195_v11 = vcombine.high %v345_v57, %v349_v1  ;;  %v397_v1 = vld [vmem:[#allocation7 + $0x5e0] sm:$0xff] }
  0x99   :  { %3354 = vmatpush1.bf16.msra.mxu0 %v4178_v12  ;;  %v4197_v12 = vcombine.high %v346_v3, %v350_v4  ;;  %v394_v3 = vld [vmem:[#allocation7 + $0x5c8] sm:$0xff] }
  0x9a   :  { %3518 = vmatpush1.bf16.msra.mxu1 %v4180_v13  ;;  %3364 = vmatprep.subr.bf16.mxu0 %v4187_v14  ;;  %v357_v13 = vld [vmem:[#allocation7 + $0x4a0] sm:$0xff]  ;;  %v354_v14 = vld [vmem:[#allocation7 + $0x488] sm:$0xff] }
  0x9b   :  { %3528 = vmatprep.subr.bf16.mxu1 %v4189_v15  ;;  %v358_v15 = vld [vmem:[#allocation7 + $0x4a8] sm:$0xff] }
  0x9c   :  { %v4204_v63 = vcombine.low %v354_v14, %v358_v15  ;;  %v398_v4 = vld [vmem:[#allocation7 + $0x5e8] sm:$0xff] }
  0xd9   :  { %v92_v36 = vpop.permute.xlu0 %91 }
  0xda   :  { %v136_v41 = vmul.f32 %v102_v27, %v92_v36  ;;  %v135_v42 = vmul.f32 %v98_v28, %v92_v36  ;;  %v138_v43 = vmul.f32 %v110_v29, %v92_v36  ;;  %v137_v44 = vmul.f32 %v106_v30, %v92_v36  ;;  %v361_v30 = vld [vmem:[#allocation7 + $0x4c0] sm:$0xff] }
  0xdb   :  { %v140_v45 = vmul.f32 %v118_v31, %v92_v36  ;;  %v139_v52 = vmul.f32 %v114_v38, %v92_v36  ;;  %v142_v53 = vmul.f32 %v126_v39, %v92_v36  ;;  %v141_v16 = vmul.f32 %v122_v58, %v92_v36  ;;  %v365_v31 = vld [vmem:[#allocation7 + $0x4e0] sm:$0xff] }
  0xdc   :  { %v186_v47 = vadd.f32 %v152_v32, %v136_v41  ;;  %v185_v48 = vadd.f32 %v148_v33, %v135_v42  ;;  %v188_v49 = vadd.f32 %v160_v34, %v138_v43  ;;  %v4914_v50 = vadd.f32 %v156_v35, %v137_v44  ;;  %v369_v32 = vld [vmem:[#allocation7 + $0x500] sm:$0xff]  ;;  %v370_v34 = vld [vmem:[#allocation7 + $0x508] sm:$0xff] }
  0xdd   :  { %v4916_v51 = vadd.f32 %v168_v37, %v140_v45  ;;  %v4925_v9 = vadd.f32 %v164_v46, %v139_v52  ;;  %v4927_v10 = vadd.f32 %v176_v54, %v142_v53  ;;  %v4941_v27 = vadd.f32 %v172_v7, %v141_v16  ;;  %v373_v33 = vld [vmem:[#allocation7 + $0x520] sm:$0xff]  ;;  %v374_v35 = vld [vmem:[#allocation7 + $0x528] sm:$0xff] }
  0xde   :  { %v194_v55 = vmax.f32 %v186_v47, 0.0  ;;  %v193_v56 = vmax.f32 %v185_v48, 0.0  ;;  %v196_v61 = vmax.f32 %v188_v49, 0.0  ;;  %v4203_v28 = vcombine.high %v353_v8, %v357_v13  ;;  %v377_v41 = vld [vmem:[#allocation7 + $0x540] sm:$0xff]  ;;  %v378_v43 = vld [vmem:[#allocation7 + $0x548] sm:$0xff] }
  0xdf   :  { %v4205_v29 = vcombine.high %v354_v14, %v358_v15  ;;  %v4211_v0 = vcombine.high %v361_v30, %v365_v31  ;;  %v4210_v36 = vcombine.low %v361_v30, %v365_v31  ;;  %v4212_v37 = vcombine.low %v362_v59, %v366_v60  ;;  %v381_v42 = vld [vmem:[#allocation7 + $0x560] sm:$0xff]  ;;  %v382_v44 = vld [vmem:[#allocation7 + $0x568] sm:$0xff] }
  0xe0   :  { %v4920_v5 = vpack.c.bf16 %v194_v55, %v194_v55  ;;  %v4922_v6 = vpack.c.bf16 %v193_v56, %v193_v56  ;;  %v4933_v17 = vpack.c.bf16 %v196_v61, %v196_v61  ;;  %v4219_v38 = vcombine.high %v369_v32, %v373_v33  ;;  %v385_v49 = vld [vmem:[#allocation7 + $0x580] sm:$0xff]  ;;  %v386_v53 = vld [vmem:[#allocation7 + $0x588] sm:$0xff] }
  0xe1   :  { %v4221_v39 = vcombine.high %v370_v34, %v374_v35  ;;  %v4218_v45 = vcombine.low %v369_v32, %v373_v33  ;;  %v4220_v46 = vcombine.low %v370_v34, %v374_v35  ;;  %v4227_v47 = vcombine.high %v377_v41, %v381_v42  ;;  %v389_v52 = vld [vmem:[#allocation7 + $0x5a0] sm:$0xff]  ;;  %v390_v54 = vld [vmem:[#allocation7 + $0x5a8] sm:$0xff] }
  0xe2   :  { %3355 = vmatprep.mubr.bf16.mxu0 %v4920_v5  ;;  %3519 = vmatprep.mubr.bf16.mxu1 %v4920_v5  ;;  %v4229_v48 = vcombine.high %v378_v43, %v382_v44  ;;  %v4226_v55 = vcombine.low %v377_v41, %v381_v42  ;;  %v4228_v56 = vcombine.low %v378_v43, %v382_v44  ;;  %v393_v61 = vld [vmem:[#allocation7 + $0x5c0] sm:$0xff]  ;;  %v402_v15 = vld [vmem:[#allocation7 + $0x608] sm:$0xff] }
  0xe3   :  { %3356 = vmatmul.mubr.bf16.vlgmr.msra.gmra.mrb[0].mxu0 %v4922_v6  ;;  %3520 = vmatmul.mubr.bf16.vlgmr.msra.gmra.mrb[0].mxu1 %v4922_v6  ;;  %v4235_v57 = vcombine.high %v385_v49, %v389_v52  ;;  %v4237_v58 = vcombine.high %v386_v53, %v390_v54  ;;  %v4234_v7 = vcombine.low %v385_v49, %v389_v52  ;;  %v405_v14 = vld [vmem:[#allocation7 + $0x620] sm:$0xff]  ;;  %v406_v16 = vld [vmem:[#allocation7 + $0x628] sm:$0xff] }
  0xe4   :  { %3365 = vmatpush1.bf16.msra.mxu0 %v4186_v62  ;;  %3529 = vmatpush1.bf16.msra.mxu1 %v4188_v2  ;;  %v4202_v62 = vcombine.low %v353_v8, %v357_v13  ;;  %v4213_v2 = vcombine.high %v362_v59, %v366_v60  ;;  %v4236_v8 = vcombine.low %v386_v53, %v390_v54  ;;  %v401_v13 = vld [vmem:[#allocation7 + $0x600] sm:$0xff]  ;;  %v410_v59 = vld [vmem:[#allocation7 + $0x648] sm:$0xff] }
  0xe5   :  { %3396 = vmatprep.mubr.bf16.mxu0 %v4933_v17  ;;  %3560 = vmatprep.mubr.bf16.mxu1 %v4933_v17  ;;  %v409_v30 = vld [vmem:[#allocation7 + $0x640] sm:$0xff]  ;;  %v414_v60 = vld [vmem:[#allocation7 + $0x668] sm:$0xff] }
  0xe6   :  { %3366 = vmatprep.subr.bf16.mxu0 %v4195_v11  ;;  %3530 = vmatprep.subr.bf16.mxu1 %v4197_v12  ;;  %v4243_v11 = vcombine.high %v393_v61, %v397_v1  ;;  %v4245_v12 = vcombine.high %v394_v3, %v398_v4  ;;  %v413_v31 = vld [vmem:[#allocation7 + $0x660] sm:$0xff]  ;;  %v418_v34 = vld [vmem:[#allocation7 + $0x688] sm:$0xff] }
  0xe7   :  { %v417_v32 = vld [vmem:[#allocation7 + $0x680] sm:$0xff]  ;;  %v422_v35 = vld [vmem:[#allocation7 + $0x6a8] sm:$0xff] }
  0xe8   :  { %3367 = vmatpush1.bf16.msra.mxu0 %v4194_v22  ;;  %3531 = vmatpush1.bf16.msra.mxu1 %v4196_v24  ;;  %v4242_v22 = vcombine.low %v393_v61, %v397_v1  ;;  %v4244_v24 = vcombine.low %v394_v3, %v398_v4  ;;  %v421_v33 = vld [vmem:[#allocation7 + $0x6a0] sm:$0xff]  ;;  %v426_v43 = vld [vmem:[#allocation7 + $0x6c8] sm:$0xff] }
  0xe9   :  { %3368 = vmatprep.subr.bf16.mxu0 %v4203_v28  ;;  %3532 = vmatprep.subr.bf16.mxu1 %v4205_v29  ;;  %v4251_v28 = vcombine.high %v401_v13, %v405_v14  ;;  %v4253_v29 = vcombine.high %v402_v15, %v406_v16  ;;  %v425_v41 = vld [vmem:[#allocation7 + $0x6c0] sm:$0xff]  ;;  %v430_v44 = vld [vmem:[#allocation7 + $0x6e8] sm:$0xff] }
  0xea   :  { %v429_v42 = vld [vmem:[#allocation7 + $0x6e0] sm:$0xff]  ;;  %v434_v53 = vld [vmem:[#allocation7 + $0x708] sm:$0xff] }
  0xeb   :  { %v433_v49 = vld [vmem:[#allocation7 + $0x700] sm:$0xff]  ;;  %v438_v54 = vld [vmem:[#allocation7 + $0x728] sm:$0xff] }
  0xec   :  { %3369 = vmatpush1.bf16.msra.mxu0 %v4202_v62  ;;  %3533 = vmatpush1.bf16.msra.mxu1 %v4204_v63  ;;  %v4250_v62 = vcombine.low %v401_v13, %v405_v14  ;;  %v4252_v63 = vcombine.low %v402_v15, %v406_v16  ;;  %v437_v52 = vld [vmem:[#allocation7 + $0x720] sm:$0xff]  ;;  %v442_v3 = vld [vmem:[#allocation7 + $0x748] sm:$0xff] }
  0xed   :  { %3370 = vmatprep.subr.bf16.mxu0 %v4211_v0  ;;  %3534 = vmatprep.subr.bf16.mxu1 %v4213_v2  ;;  %v4259_v0 = vcombine.high %v409_v30, %v413_v31  ;;  %v4261_v2 = vcombine.high %v410_v59, %v414_v60  ;;  %v441_v61 = vld [vmem:[#allocation7 + $0x740] sm:$0xff]  ;;  %v446_v4 = vld [vmem:[#allocation7 + $0x768] sm:$0xff] }
  0xee   :  { %v445_v1 = vld [vmem:[#allocation7 + $0x760] sm:$0xff]  ;;  %v450_v15 = vld [vmem:[#allocation7 + $0x788] sm:$0xff] }
  0xef   :  { %v449_v13 = vld [vmem:[#allocation7 + $0x780] sm:$0xff]  ;;  %v454_v16 = vld [vmem:[#allocation7 + $0x7a8] sm:$0xff] }
  0xf0   :  { %3371 = vmatpush1.bf16.msra.mxu0 %v4210_v36  ;;  %3535 = vmatpush1.bf16.msra.mxu1 %v4212_v37  ;;  %v4258_v36 = vcombine.low %v409_v30, %v413_v31  ;;  %v4260_v37 = vcombine.low %v410_v59, %v414_v60  ;;  %v453_v14 = vld [vmem:[#allocation7 + $0x7a0] sm:$0xff]  ;;  %v458_v59 = vld [vmem:[#allocation7 + $0x7c8] sm:$0xff] }
  0xf1   :  { %3372 = vmatprep.subr.bf16.mxu0 %v4219_v38  ;;  %3536 = vmatprep.subr.bf16.mxu1 %v4221_v39  ;;  %v4267_v38 = vcombine.high %v417_v32, %v421_v33  ;;  %v4269_v39 = vcombine.high %v418_v34, %v422_v35  ;;  %v457_v30 = vld [vmem:[#allocation7 + $0x7c0] sm:$0xff]  ;;  %v462_v60 = vld [vmem:[#allocation7 + $0x7e8] sm:$0xff] }
  0xf2   :  { %v461_v31 = vld [vmem:[#allocation7 + $0x7e0] sm:$0xff] }
  0xf4   :  { %3373 = vmatpush1.bf16.msra.mxu0 %v4218_v45  ;;  %3537 = vmatpush1.bf16.msra.mxu1 %v4220_v46  ;;  %v4266_v45 = vcombine.low %v417_v32, %v421_v33  ;;  %v4268_v46 = vcombine.low %v418_v34, %v422_v35  ;;  %v465_v32 = vld [vmem:[#allocation7 + $0x800] sm:$0xff]  ;;  %v466_v34 = vld [vmem:[#allocation7 + $0x808] sm:$0xff] }
  0xf5   :  { %3374 = vmatprep.subr.bf16.mxu0 %v4227_v47  ;;  %3538 = vmatprep.subr.bf16.mxu1 %v4229_v48  ;;  %v4275_v47 = vcombine.high %v425_v41, %v429_v42  ;;  %v4277_v48 = vcombine.high %v426_v43, %v430_v44  ;;  %v469_v33 = vld [vmem:[#allocation7 + $0x820] sm:$0xff]  ;;  %v470_v35 = vld [vmem:[#allocation7 + $0x828] sm:$0xff] }
  0xf8   :  { %3375 = vmatpush1.bf16.msra.mxu0 %v4226_v55  ;;  %3539 = vmatpush1.bf16.msra.mxu1 %v4228_v56  ;;  %v4274_v55 = vcombine.low %v425_v41, %v429_v42  ;;  %v4276_v56 = vcombine.low %v426_v43, %v430_v44  ;;  %v4317_v41 = vcombine.high %v466_v34, %v470_v35  ;;  %v198_v42 = vmax.f32 %v4916_v51, 0.0  ;;  %v473_v43 = vld [vmem:[#allocation7 + $0x840] sm:$0xff]  ;;  %v482_v51 = vld [vmem:[#allocation7 + $0x888] sm:$0xff] }
  0xf9   :  { %3376 = vmatprep.subr.bf16.mxu0 %v4235_v57  ;;  %3540 = vmatprep.subr.bf16.mxu1 %v4237_v58  ;;  %v4283_v57 = vcombine.high %v433_v49, %v437_v52  ;;  %v4285_v58 = vcombine.high %v434_v53, %v438_v54  ;;  %v477_v44 = vld [vmem:[#allocation7 + $0x860] sm:$0xff] }
  0xfc   :  { %3377 = vmatpush1.bf16.msra.mxu0 %v4234_v7  ;;  %3541 = vmatpush1.bf16.msra.mxu1 %v4236_v8  ;;  %v4282_v7 = vcombine.low %v433_v49, %v437_v52  ;;  %v4284_v8 = vcombine.low %v434_v53, %v438_v54  ;;  %v4316_v49 = vcombine.low %v466_v34, %v470_v35  ;;  %v481_v54 = vld [vmem:[#allocation7 + $0x880] sm:$0xff] }
  0xfd   :  { %3378 = vmatprep.subr.bf16.mxu0 %v4243_v11  ;;  %3542 = vmatprep.subr.bf16.mxu1 %v4245_v12  ;;  %v4291_v11 = vcombine.high %v441_v61, %v445_v1  ;;  %v4293_v12 = vcombine.high %v442_v3, %v446_v4  ;;  %v4949_v52 = vpack.c.bf16 %v198_v42, %v198_v42  ;;  %v513_v34 = vld [vmem:[#allocation7 + $0x980] sm:$0xff] }
  0xfe   :  { %v4323_v53 = vcombine.high %v473_v43, %v477_v44  ;;  %v517_v35 = vld [vmem:[#allocation7 + $0x9a0] sm:$0xff] }
 0x100   :  { %3379 = vmatpush1.bf16.msra.mxu0 %v4242_v22  ;;  %3543 = vmatpush1.bf16.msra.mxu1 %v4244_v24  ;;  %v4290_v22 = vcombine.low %v441_v61, %v445_v1  ;;  %v4292_v24 = vcombine.low %v442_v3, %v446_v4  ;;  %v489_v3 = vld [vmem:[#allocation7 + $0x8c0] sm:$0xff] }
 0x101   :  { %3380 = vmatprep.subr.bf16.mxu0 %v4251_v28  ;;  %3544 = vmatprep.subr.bf16.mxu1 %v4253_v29  ;;  %v4299_v28 = vcombine.high %v449_v13, %v453_v14  ;;  %v4301_v29 = vcombine.high %v450_v15, %v454_v16  ;;  %v493_v4 = vld [vmem:[#allocation7 + $0x8e0] sm:$0xff] }
 0x104   :  { %3381 = vmatpush1.bf16.msra.mxu0 %v4250_v62  ;;  %3545 = vmatpush1.bf16.msra.mxu1 %v4252_v63  ;;  %v4298_v62 = vcombine.low %v449_v13, %v453_v14  ;;  %v4300_v63 = vcombine.low %v450_v15, %v454_v16  ;;  %v4339_v13 = vcombine.high %v489_v3, %v493_v4  ;;  %v497_v15 = vld [vmem:[#allocation7 + $0x900] sm:$0xff] }
 0x105   :  { %3382 = vmatprep.subr.bf16.mxu0 %v4259_v0  ;;  %3546 = vmatprep.subr.bf16.mxu1 %v4261_v2  ;;  %v4307_v0 = vcombine.high %v457_v30, %v461_v31  ;;  %v4309_v2 = vcombine.high %v458_v59, %v462_v60  ;;  %v501_v16 = vld [vmem:[#allocation7 + $0x920] sm:$0xff] }
 0x108   :  { %3383 = vmatpush1.bf16.msra.mxu0 %v4258_v36  ;;  %3547 = vmatpush1.bf16.msra.mxu1 %v4260_v37  ;;  %v4306_v36 = vcombine.low %v457_v30, %v461_v31  ;;  %v4308_v37 = vcombine.low %v458_v59, %v462_v60  ;;  %v4347_v30 = vcombine.high %v497_v15, %v501_v16  ;;  %v505_v59 = vld [vmem:[#allocation7 + $0x940] sm:$0xff] }
 0x109   :  { %3384 = vmatprep.subr.bf16.mxu0 %v4267_v38  ;;  %3548 = vmatprep.subr.bf16.mxu1 %v4269_v39  ;;  %v195_v38 = vmax.f32 %v4914_v50, 0.0  ;;  %v4315_v39 = vcombine.high %v465_v32, %v469_v33  ;;  %v509_v60 = vld [vmem:[#allocation7 + $0x960] sm:$0xff] }
 0x10c   :  { %3385 = vmatpush1.bf16.msra.mxu0 %v4266_v45  ;;  %3549 = vmatpush1.bf16.msra.mxu1 %v4268_v46  ;;  %v474_v45 = vld [vmem:[#allocation7 + $0x848] sm:$0xff] }
 0x10d   :  { %3386 = vmatprep.subr.bf16.mxu0 %v4275_v47  ;;  %3550 = vmatprep.subr.bf16.mxu1 %v4277_v48  ;;  %v478_v46 = vld [vmem:[#allocation7 + $0x868] sm:$0xff]  ;;  %v4314_v47 = vcombine.low %v465_v32, %v469_v33  ;;  %v4947_v48 = vpack.c.bf16 %v195_v38, %v195_v38  ;;  %v4355_v32 = vcombine.high %v505_v59, %v509_v60 }
 0x10e   :  { %v4325_v50 = vcombine.high %v474_v45, %v478_v46  ;;  %v4354_v38 = vcombine.low %v505_v59, %v509_v60  ;;  %v553_v59 = vld [vmem:[#allocation7 + $0xac0] sm:$0xff] }
 0x10f   :  { %v557_v60 = vld [vmem:[#allocation7 + $0xae0] sm:$0xff] }
 0x110   :  { %3387 = vmatpush1.bf16.msra.mxu0 %v4274_v55  ;;  %3551 = vmatpush1.bf16.msra.mxu1 %v4276_v56  ;;  %v485_v55 = vld [vmem:[#allocation7 + $0x8a0] sm:$0xff]  ;;  %v486_v56 = vld [vmem:[#allocation7 + $0x8a8] sm:$0xff] }
 0x111   :  { %3388 = vmatprep.subr.bf16.mxu0 %v4283_v57  ;;  %3552 = vmatprep.subr.bf16.mxu1 %v4285_v58  ;;  %v4322_v57 = vcombine.low %v473_v43, %v477_v44  ;;  %v4324_v58 = vcombine.low %v474_v45, %v478_v46  ;;  %v4331_v61 = vcombine.high %v481_v54, %v485_v55  ;;  %v521_v43 = vld [vmem:[#allocation7 + $0x9c0] sm:$0xff]  ;;  %v522_v45 = vld [vmem:[#allocation7 + $0x9c8] sm:$0xff] }
 0x112   :  { %v4333_v1 = vcombine.high %v482_v51, %v486_v56  ;;  %v525_v44 = vld [vmem:[#allocation7 + $0x9e0] sm:$0xff]  ;;  %v526_v46 = vld [vmem:[#allocation7 + $0x9e8] sm:$0xff] }
 0x114   :  { %3389 = vmatpush1.bf16.msra.mxu0 %v4282_v7  ;;  %3553 = vmatpush1.bf16.msra.mxu1 %v4284_v8  ;;  %v490_v7 = vld [vmem:[#allocation7 + $0x8c8] sm:$0xff] }
 0x115   :  { %3390 = vmatprep.subr.bf16.mxu0 %v4291_v11  ;;  %3554 = vmatprep.subr.bf16.mxu1 %v4293_v12  ;;  %v494_v8 = vld [vmem:[#allocation7 + $0x8e8] sm:$0xff]  ;;  %v4330_v11 = vcombine.low %v481_v54, %v485_v55  ;;  %v4332_v12 = vcombine.low %v482_v51, %v486_v56  ;;  %v529_v54 = vld [vmem:[#allocation7 + $0xa00] sm:$0xff] }
 0x116   :  { %v4341_v14 = vcombine.high %v490_v7, %v494_v8  ;;  %v533_v55 = vld [vmem:[#allocation7 + $0xa20] sm:$0xff]  ;;  %v530_v51 = vld [vmem:[#allocation7 + $0xa08] sm:$0xff] }
 0x117   :  { %v534_v56 = vld [vmem:[#allocation7 + $0xa28] sm:$0xff] }
 0x118   :  { %3391 = vmatpush1.bf16.msra.mxu0 %v4290_v22  ;;  %3555 = vmatpush1.bf16.msra.mxu1 %v4292_v24  ;;  %v498_v22 = vld [vmem:[#allocation7 + $0x908] sm:$0xff] }
 0x119   :  { %3392 = vmatprep.subr.bf16.mxu0 %v4299_v28  ;;  %3556 = vmatprep.subr.bf16.mxu1 %v4301_v29  ;;  %v502_v24 = vld [vmem:[#allocation7 + $0x928] sm:$0xff]  ;;  %v4338_v28 = vcombine.low %v489_v3, %v493_v4  ;;  %v4340_v29 = vcombine.low %v490_v7, %v494_v8  ;;  %v537_v3 = vld [vmem:[#allocation7 + $0xa40] sm:$0xff] }
 0x11a   :  { %v4349_v31 = vcombine.high %v498_v22, %v502_v24  ;;  %v541_v4 = vld [vmem:[#allocation7 + $0xa60] sm:$0xff]  ;;  %v538_v7 = vld [vmem:[#allocation7 + $0xa48] sm:$0xff] }
 0x11b   :  { %v542_v8 = vld [vmem:[#allocation7 + $0xa68] sm:$0xff] }
 0x11c   :  { %3393 = vmatpush1.bf16.msra.mxu0 %v4298_v62  ;;  %3557 = vmatpush1.bf16.msra.mxu1 %v4300_v63  ;;  %v506_v62 = vld [vmem:[#allocation7 + $0x948] sm:$0xff] }
 0x11d   :  { %3394 = vmatprep.subr.bf16.mxu0 %v4307_v0  ;;  %3558 = vmatprep.subr.bf16.mxu1 %v4309_v2  ;;  %v510_v63 = vld [vmem:[#allocation7 + $0x968] sm:$0xff]  ;;  %v4346_v0 = vcombine.low %v497_v15, %v501_v16  ;;  %v4348_v2 = vcombine.low %v498_v22, %v502_v24  ;;  %v545_v15 = vld [vmem:[#allocation7 + $0xa80] sm:$0xff] }
 0x11e   :  { %v4357_v33 = vcombine.high %v506_v62, %v510_v63  ;;  %v549_v16 = vld [vmem:[#allocation7 + $0xaa0] sm:$0xff]  ;;  %v546_v22 = vld [vmem:[#allocation7 + $0xa88] sm:$0xff] }
 0x11f   :  { %v550_v24 = vld [vmem:[#allocation7 + $0xaa8] sm:$0xff] }
 0x120   :  { %3395 = vmatpush1.bf16.msra.mxu0 %v4306_v36  ;;  %3559 = vmatpush1.bf16.msra.mxu1 %v4308_v37  ;;  %v514_v36 = vld [vmem:[#allocation7 + $0x988] sm:$0xff] }
 0x121   :  { %3405 = vmatprep.subr.bf16.mxu0 %v4315_v39  ;;  %3569 = vmatprep.subr.bf16.mxu1 %v4317_v41  ;;  %v518_v37 = vld [vmem:[#allocation7 + $0x9a8] sm:$0xff]  ;;  %v4356_v39 = vcombine.low %v506_v62, %v510_v63  ;;  %v4363_v41 = vcombine.high %v513_v34, %v517_v35 }
 0x122   :  { %v4365_v42 = vcombine.high %v514_v36, %v518_v37  ;;  %v554_v62 = vld [vmem:[#allocation7 + $0xac8] sm:$0xff] }
 0x123   :  { %3397 = vmatmul.mubr.bf16.vlgmr.msra.gmra.mrb[0].mxu0 %v4947_v48  ;;  %3561 = vmatmul.mubr.bf16.vlgmr.msra.gmra.mrb[0].mxu1 %v4947_v48  ;;  %v558_v63 = vld [vmem:[#allocation7 + $0xae8] sm:$0xff] }
 0x124   :  { %3406 = vmatpush1.bf16.msra.mxu0 %v4314_v47  ;;  %3437 = vmatprep.mubr.bf16.mxu0 %v4949_v52  ;;  %v4362_v47 = vcombine.low %v513_v34, %v517_v35  ;;  %v561_v34 = vld [vmem:[#allocation7 + $0xb00] sm:$0xff] }
 0x125   :  { %3570 = vmatpush1.bf16.msra.mxu1 %v4316_v49  ;;  %3601 = vmatprep.mubr.bf16.mxu1 %v4949_v52  ;;  %v4364_v49 = vcombine.low %v514_v36, %v518_v37  ;;  %v565_v35 = vld [vmem:[#allocation7 + $0xb20] sm:$0xff]  ;;  %v562_v36 = vld [vmem:[#allocation7 + $0xb08] sm:$0xff] }
 0x126   :  { %3407 = vmatprep.subr.bf16.mxu0 %v4323_v53  ;;  %3571 = vmatprep.subr.bf16.mxu1 %v4325_v50  ;;  %v4371_v53 = vcombine.high %v521_v43, %v525_v44  ;;  %v4373_v50 = vcombine.high %v522_v45, %v526_v46  ;;  %v566_v37 = vld [vmem:[#allocation7 + $0xb28] sm:$0xff] }
 0x128   :  { %3408 = vmatpush1.bf16.msra.mxu0 %v4322_v57  ;;  %v4370_v57 = vcombine.low %v521_v43, %v525_v44  ;;  %v569_v43 = vld [vmem:[#allocation7 + $0xb40] sm:$0xff] }
 0x129   :  { %3572 = vmatpush1.bf16.msra.mxu1 %v4324_v58  ;;  %3409 = vmatprep.subr.bf16.mxu0 %v4331_v61  ;;  %v4372_v58 = vcombine.low %v522_v45, %v526_v46  ;;  %v4379_v61 = vcombine.high %v529_v54, %v533_v55  ;;  %v573_v44 = vld [vmem:[#allocation7 + $0xb60] sm:$0xff]  ;;  %v570_v45 = vld [vmem:[#allocation7 + $0xb48] sm:$0xff] }
 0x12a   :  { %3573 = vmatprep.subr.bf16.mxu1 %v4333_v1  ;;  %v4381_v1 = vcombine.high %v530_v51, %v534_v56  ;;  %v574_v46 = vld [vmem:[#allocation7 + $0xb68] sm:$0xff] }
 0x12c   :  { %3410 = vmatpush1.bf16.msra.mxu0 %v4330_v11  ;;  %v4378_v11 = vcombine.low %v529_v54, %v533_v55  ;;  %v577_v54 = vld [vmem:[#allocation7 + $0xb80] sm:$0xff] }
 0x12d   :  { %3574 = vmatpush1.bf16.msra.mxu1 %v4332_v12  ;;  %3411 = vmatprep.subr.bf16.mxu0 %v4339_v13  ;;  %v4380_v12 = vcombine.low %v530_v51, %v534_v56  ;;  %v4387_v13 = vcombine.high %v537_v3, %v541_v4  ;;  %v581_v55 = vld [vmem:[#allocation7 + $0xba0] sm:$0xff]  ;;  %v578_v51 = vld [vmem:[#allocation7 + $0xb88] sm:$0xff] }
 0x12e   :  { %3575 = vmatprep.subr.bf16.mxu1 %v4341_v14  ;;  %v4389_v14 = vcombine.high %v538_v7, %v542_v8  ;;  %v582_v56 = vld [vmem:[#allocation7 + $0xba8] sm:$0xff] }
 0x130   :  { %3412 = vmatpush1.bf16.msra.mxu0 %v4338_v28  ;;  %v4386_v28 = vcombine.low %v537_v3, %v541_v4  ;;  %v585_v3 = vld [vmem:[#allocation7 + $0xbc0] sm:$0xff] }
 0x131   :  { %3576 = vmatpush1.bf16.msra.mxu1 %v4340_v29  ;;  %3413 = vmatprep.subr.bf16.mxu0 %v4347_v30  ;;  %v4388_v29 = vcombine.low %v538_v7, %v542_v8  ;;  %v4395_v30 = vcombine.high %v545_v15, %v549_v16  ;;  %v589_v4 = vld [vmem:[#allocation7 + $0xbe0] sm:$0xff]  ;;  %v586_v7 = vld [vmem:[#allocation7 + $0xbc8] sm:$0xff] }
 0x132   :  { %3577 = vmatprep.subr.bf16.mxu1 %v4349_v31  ;;  %v4397_v31 = vcombine.high %v546_v22, %v550_v24  ;;  %v590_v8 = vld [vmem:[#allocation7 + $0xbe8] sm:$0xff] }
 0x134   :  { %3414 = vmatpush1.bf16.msra.mxu0 %v4346_v0  ;;  %v4394_v0 = vcombine.low %v545_v15, %v549_v16  ;;  %v593_v15 = vld [vmem:[#allocation7 + $0xc00] sm:$0xff] }
 0x135   :  { %3578 = vmatpush1.bf16.msra.mxu1 %v4348_v2  ;;  %3415 = vmatprep.subr.bf16.mxu0 %v4355_v32  ;;  %v4396_v2 = vcombine.low %v546_v22, %v550_v24  ;;  %v4403_v32 = vcombine.high %v553_v59, %v557_v60  ;;  %v597_v16 = vld [vmem:[#allocation7 + $0xc20] sm:$0xff]  ;;  %v594_v22 = vld [vmem:[#allocation7 + $0xc08] sm:$0xff] }
 0x136   :  { %3579 = vmatprep.subr.bf16.mxu1 %v4357_v33  ;;  %v4405_v33 = vcombine.high %v554_v62, %v558_v63  ;;  %v598_v24 = vld [vmem:[#allocation7 + $0xc28] sm:$0xff] }
 0x138   :  { %3416 = vmatpush1.bf16.msra.mxu0 %v4354_v38  ;;  %v4402_v38 = vcombine.low %v553_v59, %v557_v60  ;;  %v4445_v59 = vcombine.high %v594_v22, %v598_v24  ;;  %v200_v60 = vmax.f32 %v4927_v10, 0.0 }
 0x139   :  { %3580 = vmatpush1.bf16.msra.mxu1 %v4356_v39  ;;  %3417 = vmatprep.subr.bf16.mxu0 %v4363_v41  ;;  %v4404_v39 = vcombine.low %v554_v62, %v558_v63  ;;  %v4411_v41 = vcombine.high %v561_v34, %v565_v35  ;;  %v601_v62 = vld [vmem:[#allocation7 + $0xc40] sm:$0xff] }
 0x13a   :  { %3581 = vmatprep.subr.bf16.mxu1 %v4365_v42  ;;  %v4413_v42 = vcombine.high %v562_v36, %v566_v37  ;;  %v605_v63 = vld [vmem:[#allocation7 + $0xc60] sm:$0xff] }
 0x13c   :  { %3418 = vmatpush1.bf16.msra.mxu0 %v4362_v47  ;;  %v4410_v47 = vcombine.low %v561_v34, %v565_v35  ;;  %v4444_v34 = vcombine.low %v594_v22, %v598_v24  ;;  %v4451_v35 = vcombine.high %v601_v62, %v605_v63  ;;  %v641_v22 = vld [vmem:[#allocation7 + $0xd80] sm:$0xff] }
 0x13d   :  { %3582 = vmatpush1.bf16.msra.mxu1 %v4364_v49  ;;  %3419 = vmatprep.subr.bf16.mxu0 %v4371_v53  ;;  %v4412_v49 = vcombine.low %v562_v36, %v566_v37  ;;  %v4419_v53 = vcombine.high %v569_v43, %v573_v44  ;;  %v609_v36 = vld [vmem:[#allocation7 + $0xc80] sm:$0xff]  ;;  %v4960_v37 = vpack.c.bf16 %v200_v60, %v200_v60 }
 0x13e   :  { %3583 = vmatprep.subr.bf16.mxu1 %v4373_v50  ;;  %v4421_v50 = vcombine.high %v570_v45, %v574_v46  ;;  %v645_v24 = vld [vmem:[#allocation7 + $0xda0] sm:$0xff] }
 0x140   :  { %3420 = vmatpush1.bf16.msra.mxu0 %v4370_v57  ;;  %v4418_v57 = vcombine.low %v569_v43, %v573_v44 }
 0x141   :  { %3584 = vmatpush1.bf16.msra.mxu1 %v4372_v58  ;;  %3421 = vmatprep.subr.bf16.mxu0 %v4379_v61  ;;  %v4420_v58 = vcombine.low %v570_v45, %v574_v46  ;;  %v4427_v61 = vcombine.high %v577_v54, %v581_v55  ;;  %v617_v45 = vld [vmem:[#allocation7 + $0xcc0] sm:$0xff] }
 0x142   :  { %3585 = vmatprep.subr.bf16.mxu1 %v4381_v1  ;;  %v4429_v1 = vcombine.high %v578_v51, %v582_v56  ;;  %v621_v46 = vld [vmem:[#allocation7 + $0xce0] sm:$0xff] }
 0x144   :  { %3422 = vmatpush1.bf16.msra.mxu0 %v4378_v11  ;;  %v4426_v11 = vcombine.low %v577_v54, %v581_v55  ;;  %v4467_v54 = vcombine.high %v617_v45, %v621_v46 }
 0x145   :  { %3586 = vmatpush1.bf16.msra.mxu1 %v4380_v12  ;;  %3423 = vmatprep.subr.bf16.mxu0 %v4387_v13  ;;  %v4428_v12 = vcombine.low %v578_v51, %v582_v56  ;;  %v4435_v13 = vcombine.high %v585_v3, %v589_v4  ;;  %v625_v51 = vld [vmem:[#allocation7 + $0xd00] sm:$0xff] }
 0x146   :  { %3587 = vmatprep.subr.bf16.mxu1 %v4389_v14  ;;  %v4437_v14 = vcombine.high %v586_v7, %v590_v8  ;;  %v629_v56 = vld [vmem:[#allocation7 + $0xd20] sm:$0xff] }
 0x148   :  { %3424 = vmatpush1.bf16.msra.mxu0 %v4386_v28  ;;  %v4434_v28 = vcombine.low %v585_v3, %v589_v4  ;;  %v4475_v3 = vcombine.high %v625_v51, %v629_v56 }
 0x149   :  { %3588 = vmatpush1.bf16.msra.mxu1 %v4388_v29  ;;  %3425 = vmatprep.subr.bf16.mxu0 %v4395_v30  ;;  %v4436_v29 = vcombine.low %v586_v7, %v590_v8  ;;  %v197_v30 = vmax.f32 %v4925_v9, 0.0  ;;  %v613_v9 = vld [vmem:[#allocation7 + $0xca0] sm:$0xff] }
 0x14a   :  { %3589 = vmatprep.subr.bf16.mxu1 %v4397_v31  ;;  %v4443_v31 = vcombine.high %v593_v15, %v597_v16  ;;  %v4459_v43 = vcombine.high %v609_v36, %v613_v9  ;;  %v633_v7 = vld [vmem:[#allocation7 + $0xd40] sm:$0xff] }
 0x14b   :  { %v637_v8 = vld [vmem:[#allocation7 + $0xd60] sm:$0xff] }
 0x14c   :  { %3426 = vmatpush1.bf16.msra.mxu0 %v4394_v0  ;;  %v4442_v0 = vcombine.low %v593_v15, %v597_v16  ;;  %v4483_v15 = vcombine.high %v633_v7, %v637_v8 }
 0x14d   :  { %3590 = vmatpush1.bf16.msra.mxu1 %v4396_v2  ;;  %3427 = vmatprep.subr.bf16.mxu0 %v4403_v32  ;;  %v602_v2 = vld [vmem:[#allocation7 + $0xc48] sm:$0xff] }
 0x14e   :  { %3591 = vmatprep.subr.bf16.mxu1 %v4405_v33  ;;  %v606_v32 = vld [vmem:[#allocation7 + $0xc68] sm:$0xff]  ;;  %v4957_v33 = vpack.c.bf16 %v197_v30, %v197_v30  ;;  %v4482_v30 = vcombine.low %v633_v7, %v637_v8  ;;  %v681_v7 = vld [vmem:[#allocation7 + $0xec0] sm:$0xff] }
 0x14f   :  { %v4453_v10 = vcombine.high %v602_v2, %v606_v32  ;;  %v685_v8 = vld [vmem:[#allocation7 + $0xee0] sm:$0xff] }
 0x150   :  { %3428 = vmatpush1.bf16.msra.mxu0 %v4402_v38  ;;  %v610_v38 = vld [vmem:[#allocation7 + $0xc88] sm:$0xff] }
 0x151   :  { %3592 = vmatpush1.bf16.msra.mxu1 %v4404_v39  ;;  %3429 = vmatprep.subr.bf16.mxu0 %v4411_v41  ;;  %v614_v39 = vld [vmem:[#allocation7 + $0xca8] sm:$0xff]  ;;  %v4450_v41 = vcombine.low %v601_v62, %v605_v63  ;;  %v649_v62 = vld [vmem:[#allocation7 + $0xdc0] sm:$0xff] }
 0x152   :  { %3593 = vmatprep.subr.bf16.mxu1 %v4413_v42  ;;  %v4452_v42 = vcombine.low %v602_v2, %v606_v32  ;;  %v4461_v44 = vcombine.high %v610_v38, %v614_v39  ;;  %v653_v63 = vld [vmem:[#allocation7 + $0xde0] sm:$0xff]  ;;  %v654_v2 = vld [vmem:[#allocation7 + $0xde8] sm:$0xff]  ;;  %v4490_v32 = vcombine.low %v641_v22, %v645_v24 }
 0x154   :  { %3430 = vmatpush1.bf16.msra.mxu0 %v4410_v47  ;;  %v618_v47 = vld [vmem:[#allocation7 + $0xcc8] sm:$0xff] }
 0x155   :  { %3594 = vmatpush1.bf16.msra.mxu1 %v4412_v49  ;;  %3431 = vmatprep.subr.bf16.mxu0 %v4419_v53  ;;  %v622_v49 = vld [vmem:[#allocation7 + $0xce8] sm:$0xff]  ;;  %v4458_v53 = vcombine.low %v609_v36, %v613_v9  ;;  %v657_v9 = vld [vmem:[#allocation7 + $0xe00] sm:$0xff] }
 0x156   :  { %3595 = vmatprep.subr.bf16.mxu1 %v4421_v50  ;;  %v4460_v50 = vcombine.low %v610_v38, %v614_v39  ;;  %v4469_v55 = vcombine.high %v618_v47, %v622_v49  ;;  %v658_v38 = vld [vmem:[#allocation7 + $0xe08] sm:$0xff] }
 0x157   :  { %v662_v39 = vld [vmem:[#allocation7 + $0xe28] sm:$0xff] }
 0x158   :  { %3432 = vmatpush1.bf16.msra.mxu0 %v4418_v57  ;;  %v626_v57 = vld [vmem:[#allocation7 + $0xd08] sm:$0xff] }
 0x159   :  { %3596 = vmatpush1.bf16.msra.mxu1 %v4420_v58  ;;  %3433 = vmatprep.subr.bf16.mxu0 %v4427_v61  ;;  %v630_v58 = vld [vmem:[#allocation7 + $0xd28] sm:$0xff]  ;;  %v4466_v61 = vcombine.low %v617_v45, %v621_v46  ;;  %v665_v45 = vld [vmem:[#allocation7 + $0xe40] sm:$0xff] }
 0x15a   :  { %3597 = vmatprep.subr.bf16.mxu1 %v4429_v1  ;;  %v4468_v1 = vcombine.low %v618_v47, %v622_v49  ;;  %v4477_v4 = vcombine.high %v626_v57, %v630_v58  ;;  %v669_v46 = vld [vmem:[#allocation7 + $0xe60] sm:$0xff]  ;;  %v666_v47 = vld [vmem:[#allocation7 + $0xe48] sm:$0xff] }
 0x15b   :  { %v670_v49 = vld [vmem:[#allocation7 + $0xe68] sm:$0xff] }
 0x15c   :  { %3434 = vmatpush1.bf16.msra.mxu0 %v4426_v11  ;;  %v634_v11 = vld [vmem:[#allocation7 + $0xd48] sm:$0xff] }
 0x15d   :  { %3598 = vmatpush1.bf16.msra.mxu1 %v4428_v12  ;;  %3435 = vmatprep.subr.bf16.mxu0 %v4435_v13  ;;  %v638_v12 = vld [vmem:[#allocation7 + $0xd68] sm:$0xff]  ;;  %v4474_v13 = vcombine.low %v625_v51, %v629_v56  ;;  %v673_v51 = vld [vmem:[#allocation7 + $0xe80] sm:$0xff] }
 0x15e   :  { %3599 = vmatprep.subr.bf16.mxu1 %v4437_v14  ;;  %v4476_v14 = vcombine.low %v626_v57, %v630_v58  ;;  %v4485_v16 = vcombine.high %v634_v11, %v638_v12  ;;  %v677_v56 = vld [vmem:[#allocation7 + $0xea0] sm:$0xff]  ;;  %v674_v57 = vld [vmem:[#allocation7 + $0xe88] sm:$0xff] }
 0x15f   :  { %v678_v58 = vld [vmem:[#allocation7 + $0xea8] sm:$0xff] }
 0x160   :  { %3436 = vmatpush1.bf16.msra.mxu0 %v4434_v28  ;;  %v642_v28 = vld [vmem:[#allocation7 + $0xd88] sm:$0xff] }
 0x161   :  { %3600 = vmatpush1.bf16.msra.mxu1 %v4436_v29  ;;  %3446 = vmatprep.subr.bf16.mxu0 %v4443_v31  ;;  %v646_v29 = vld [vmem:[#allocation7 + $0xda8] sm:$0xff]  ;;  %v4484_v31 = vcombine.low %v634_v11, %v638_v12 }
 0x162   :  { %3610 = vmatprep.subr.bf16.mxu1 %v4445_v59  ;;  %v4491_v59 = vcombine.high %v641_v22, %v645_v24  ;;  %v4493_v60 = vcombine.high %v642_v28, %v646_v29  ;;  %v682_v11 = vld [vmem:[#allocation7 + $0xec8] sm:$0xff]  ;;  %v689_v22 = vld [vmem:[#allocation7 + $0xf00] sm:$0xff] }
 0x163   :  { %3438 = vmatmul.mubr.bf16.vlgmr.msra.gmra.mrb[0].mxu0 %v4957_v33  ;;  %v686_v12 = vld [vmem:[#allocation7 + $0xee8] sm:$0xff]  ;;  %v693_v24 = vld [vmem:[#allocation7 + $0xf20] sm:$0xff] }
 0x164   :  { %3602 = vmatmul.mubr.bf16.vlgmr.msra.gmra.mrb[0].mxu1 %v4957_v33  ;;  %3447 = vmatpush1.bf16.msra.mxu0 %v4442_v0  ;;  %v650_v0 = vld [vmem:[#allocation7 + $0xdc8] sm:$0xff] }
 0x165   :  { %3478 = vmatprep.mubr.bf16.mxu0 %v4960_v37  ;;  %3611 = vmatpush1.bf16.msra.mxu1 %v4444_v34  ;;  %v4492_v34 = vcombine.low %v642_v28, %v646_v29  ;;  %v4501_v36 = vcombine.high %v650_v0, %v654_v2  ;;  %v690_v28 = vld [vmem:[#allocation7 + $0xf08] sm:$0xff] }
 0x166   :  { %3642 = vmatprep.mubr.bf16.mxu1 %v4960_v37  ;;  %3448 = vmatprep.subr.bf16.mxu0 %v4451_v35  ;;  %v4499_v35 = vcombine.high %v649_v62, %v653_v63  ;;  %v694_v29 = vld [vmem:[#allocation7 + $0xf28] sm:$0xff] }
 0x167   :  { %3612 = vmatprep.subr.bf16.mxu1 %v4453_v10  ;;  %v661_v10 = vld [vmem:[#allocation7 + $0xe20] sm:$0xff] }
 0x168   :  { %3449 = vmatpush1.bf16.msra.mxu0 %v4450_v41  ;;  %v4498_v41 = vcombine.low %v649_v62, %v653_v63  ;;  %v697_v62 = vld [vmem:[#allocation7 + $0xf40] sm:$0xff] }
 0x169   :  { %3613 = vmatpush1.bf16.msra.mxu1 %v4452_v42  ;;  %3450 = vmatprep.subr.bf16.mxu0 %v4459_v43  ;;  %v4500_v42 = vcombine.low %v650_v0, %v654_v2  ;;  %v4507_v43 = vcombine.high %v657_v9, %v661_v10  ;;  %v701_v63 = vld [vmem:[#allocation7 + $0xf60] sm:$0xff]  ;;  %v698_v0 = vld [vmem:[#allocation7 + $0xf48] sm:$0xff] }
 0x16a   :  { %3614 = vmatprep.subr.bf16.mxu1 %v4461_v44  ;;  %v4509_v44 = vcombine.high %v658_v38, %v662_v39  ;;  %v702_v2 = vld [vmem:[#allocation7 + $0xf68] sm:$0xff] }
 0x16c   :  { %3451 = vmatpush1.bf16.msra.mxu0 %v4458_v53  ;;  %v4506_v53 = vcombine.low %v657_v9, %v661_v10  ;;  %v705_v9 = vld [vmem:[#allocation7 + $0xf80] sm:$0xff] }
 0x16d   :  { %3615 = vmatpush1.bf16.msra.mxu1 %v4460_v50  ;;  %3452 = vmatprep.subr.bf16.mxu0 %v4467_v54  ;;  %v4508_v50 = vcombine.low %v658_v38, %v662_v39  ;;  %v4515_v54 = vcombine.high %v665_v45, %v669_v46  ;;  %v709_v10 = vld [vmem:[#allocation7 + $0xfa0] sm:$0xff]  ;;  %v706_v38 = vld [vmem:[#allocation7 + $0xf88] sm:$0xff] }
 0x16e   :  { %3616 = vmatprep.subr.bf16.mxu1 %v4469_v55  ;;  %v4517_v55 = vcombine.high %v666_v47, %v670_v49  ;;  %v710_v39 = vld [vmem:[#allocation7 + $0xfa8] sm:$0xff] }
 0x170   :  { %3453 = vmatpush1.bf16.msra.mxu0 %v4466_v61  ;;  %v4514_v61 = vcombine.low %v665_v45, %v669_v46  ;;  %v713_v45 = vld [vmem:[#allocation7 + $0xfc0] sm:$0xff] }
 0x171   :  { %3617 = vmatpush1.bf16.msra.mxu1 %v4468_v1  ;;  %3454 = vmatprep.subr.bf16.mxu0 %v4475_v3  ;;  %v4516_v1 = vcombine.low %v666_v47, %v670_v49  ;;  %v4523_v3 = vcombine.high %v673_v51, %v677_v56  ;;  %v717_v46 = vld [vmem:[#allocation7 + $0xfe0] sm:$0xff]  ;;  %v714_v47 = vld [vmem:[#allocation7 + $0xfc8] sm:$0xff] }
 0x172   :  { %3618 = vmatprep.subr.bf16.mxu1 %v4477_v4  ;;  %v4525_v4 = vcombine.high %v674_v57, %v678_v58  ;;  %v718_v49 = vld [vmem:[#allocation7 + $0xfe8] sm:$0xff] }
 0x174   :  { %3455 = vmatpush1.bf16.msra.mxu0 %v4474_v13  ;;  %v4522_v13 = vcombine.low %v673_v51, %v677_v56  ;;  %v211_v51 = vld [vmem:[#allocation7 + $0x10] sm:$0xff] }
 0x175   :  { %3619 = vmatpush1.bf16.msra.mxu1 %v4476_v14  ;;  %3456 = vmatprep.subr.bf16.mxu0 %v4483_v15  ;;  %v4524_v14 = vcombine.low %v674_v57, %v678_v58  ;;  %v4531_v15 = vcombine.high %v681_v7, %v685_v8  ;;  %v215_v56 = vld [vmem:[#allocation7 + $0x30] sm:$0xff]  ;;  %v212_v57 = vld [vmem:[#allocation7 + $0x18] sm:$0xff] }
 0x176   :  { %3620 = vmatprep.subr.bf16.mxu1 %v4485_v16  ;;  %v4533_v16 = vcombine.high %v682_v11, %v686_v12  ;;  %v216_v58 = vld [vmem:[#allocation7 + $0x38] sm:$0xff] }
 0x178   :  { %3457 = vmatpush1.bf16.msra.mxu0 %v4482_v30  ;;  %v4530_v30 = vcombine.low %v681_v7, %v685_v8  ;;  %v4065_v7 = vcombine.high %v212_v57, %v216_v58  ;;  %v219_v8 = vld [vmem:[#allocation7 + $0x50] sm:$0xff] }
 0x179   :  { %3621 = vmatpush1.bf16.msra.mxu1 %v4484_v31  ;;  %3458 = vmatprep.subr.bf16.mxu0 %v4491_v59  ;;  %v4532_v31 = vcombine.low %v682_v11, %v686_v12  ;;  %v4539_v59 = vcombine.high %v689_v22, %v693_v24  ;;  %v223_v11 = vld [vmem:[#allocation7 + $0x70] sm:$0xff]  ;;  %v4062_v12 = vcombine.low %v211_v51, %v215_v56 }
 0x17a   :  { %3622 = vmatprep.subr.bf16.mxu1 %v4493_v60  ;;  %v4541_v60 = vcombine.high %v690_v28, %v694_v29 }
 0x17c   :  { %3459 = vmatpush1.bf16.msra.mxu0 %v4490_v32  ;;  %v4538_v32 = vcombine.low %v689_v22, %v693_v24  ;;  %v4071_v22 = vcombine.high %v219_v8, %v223_v11  ;;  %v227_v24 = vld [vmem:[#allocation7 + $0x90] sm:$0xff] }
 0x17d   :  { %3623 = vmatpush1.bf16.msra.mxu1 %v4492_v34  ;;  %3460 = vmatprep.subr.bf16.mxu0 %v4499_v35  ;;  %v4540_v34 = vcombine.low %v690_v28, %v694_v29  ;;  %v4547_v35 = vcombine.high %v697_v62, %v701_v63  ;;  %v231_v28 = vld [vmem:[#allocation7 + $0xb0] sm:$0xff]  ;;  %v228_v29 = vld [vmem:[#allocation7 + $0x98] sm:$0xff] }
 0x17e   :  { %3624 = vmatprep.subr.bf16.mxu1 %v4501_v36  ;;  %v4549_v36 = vcombine.high %v698_v0, %v702_v2 }
 0x180   :  { %3461 = vmatpush1.bf16.msra.mxu0 %v4498_v41  ;;  %v4546_v41 = vcombine.low %v697_v62, %v701_v63  ;;  %v235_v63 = vld [vmem:[#allocation7 + $0xd0] sm:$0xff] }
 0x181   :  { %3625 = vmatpush1.bf16.msra.mxu1 %v4500_v42  ;;  %3462 = vmatprep.subr.bf16.mxu0 %v4507_v43  ;;  %v4548_v42 = vcombine.low %v698_v0, %v702_v2  ;;  %v4555_v43 = vcombine.high %v705_v9, %v709_v10  ;;  %v239_v0 = vld [vmem:[#allocation7 + $0xf0] sm:$0xff]  ;;  %v236_v2 = vld [vmem:[#allocation7 + $0xd8] sm:$0xff] }
 0x182   :  { %3626 = vmatprep.subr.bf16.mxu1 %v4509_v44  ;;  %v4557_v44 = vcombine.high %v706_v38, %v710_v39 }
 0x184   :  { %3463 = vmatpush1.bf16.msra.mxu0 %v4506_v53  ;;  %v4554_v53 = vcombine.low %v705_v9, %v709_v10  ;;  %v243_v10 = vld [vmem:[#allocation7 + $0x110] sm:$0xff] }
 0x185   :  { %3627 = vmatpush1.bf16.msra.mxu1 %v4508_v50  ;;  %3464 = vmatprep.subr.bf16.mxu0 %v4515_v54  ;;  %v4556_v50 = vcombine.low %v706_v38, %v710_v39  ;;  %v4563_v54 = vcombine.high %v713_v45, %v717_v46  ;;  %v247_v38 = vld [vmem:[#allocation7 + $0x130] sm:$0xff]  ;;  %v244_v39 = vld [vmem:[#allocation7 + $0x118] sm:$0xff] }
 0x186   :  { %3628 = vmatprep.subr.bf16.mxu1 %v4517_v55  ;;  %v4565_v55 = vcombine.high %v714_v47, %v718_v49 }
 0x188   :  { %3465 = vmatpush1.bf16.msra.mxu0 %v4514_v61  ;;  %v4562_v61 = vcombine.low %v713_v45, %v717_v46  ;;  %v251_v45 = vld [vmem:[#allocation7 + $0x150] sm:$0xff] }
 0x189   :  { %3629 = vmatpush1.bf16.msra.mxu1 %v4516_v1  ;;  %3466 = vmatprep.subr.bf16.mxu0 %v4523_v3  ;;  %v4564_v1 = vcombine.low %v714_v47, %v718_v49  ;;  %v199_v3 = vmax.f32 %v4941_v27, 0.0  ;;  %v255_v46 = vld [vmem:[#allocation7 + $0x170] sm:$0xff]  ;;  %v252_v47 = vld [vmem:[#allocation7 + $0x158] sm:$0xff] }
 0x18a   :  { %3630 = vmatprep.subr.bf16.mxu1 %v4525_v4  ;;  %v4063_v4 = vcombine.high %v211_v51, %v215_v56  ;;  %v256_v49 = vld [vmem:[#allocation7 + $0x178] sm:$0xff]  ;;  %v259_v51 = vld [vmem:[#allocation7 + $0x190] sm:$0xff] }
 0x18b   :  { %v263_v56 = vld [vmem:[#allocation7 + $0x1b0] sm:$0xff] }
 0x18c   :  { %3467 = vmatpush1.bf16.msra.mxu0 %v4522_v13  ;;  %v220_v13 = vld [vmem:[#allocation7 + $0x58] sm:$0xff] }
 0x18d   :  { %3631 = vmatpush1.bf16.msra.mxu1 %v4524_v14  ;;  %3468 = vmatprep.subr.bf16.mxu0 %v4531_v15  ;;  %v224_v14 = vld [vmem:[#allocation7 + $0x78] sm:$0xff]  ;;  %v4966_v15 = vpack.c.bf16 %v199_v3, %v199_v3  ;;  %v4111_v3 = vcombine.high %v259_v51, %v263_v56 }
 0x18e   :  { %3632 = vmatprep.subr.bf16.mxu1 %v4533_v16  ;;  %v4064_v16 = vcombine.low %v212_v57, %v216_v58  ;;  %v4073_v27 = vcombine.high %v220_v13, %v224_v14  ;;  %v260_v57 = vld [vmem:[#allocation7 + $0x198] sm:$0xff] }
 0x18f   :  { %v264_v58 = vld [vmem:[#allocation7 + $0x1b8] sm:$0xff] }
 0x190   :  { %3469 = vmatpush1.bf16.msra.mxu0 %v4530_v30  ;;  %v232_v30 = vld [vmem:[#allocation7 + $0xb8] sm:$0xff] }
 0x191   :  { %3633 = vmatpush1.bf16.msra.mxu1 %v4532_v31  ;;  %3470 = vmatprep.subr.bf16.mxu0 %v4539_v59  ;;  %v4070_v31 = vcombine.low %v219_v8, %v223_v11  ;;  %v4072_v59 = vcombine.low %v220_v13, %v224_v14  ;;  %v4081_v62 = vcombine.high %v228_v29, %v232_v30  ;;  %v271_v8 = vld [vmem:[#allocation7 + $0x1f0] sm:$0xff]  ;;  %v268_v11 = vld [vmem:[#allocation7 + $0x1d8] sm:$0xff] }
 0x192   :  { %3634 = vmatprep.subr.bf16.mxu1 %v4541_v60  ;;  %v4079_v60 = vcombine.high %v227_v24, %v231_v28  ;;  %v4110_v13 = vcombine.low %v259_v51, %v263_v56  ;;  %v4112_v14 = vcombine.low %v260_v57, %v264_v58  ;;  %v311_v51 = vld [vmem:[#allocation7 + $0x330] sm:$0xff]  ;;  %v308_v56 = vld [vmem:[#allocation7 + $0x318] sm:$0xff] }
 0x194   :  { %3471 = vmatpush1.bf16.msra.mxu0 %v4538_v32  ;;  %v240_v32 = vld [vmem:[#allocation7 + $0xf8] sm:$0xff] }
 0x195   :  { %3635 = vmatpush1.bf16.msra.mxu1 %v4540_v34  ;;  %3472 = vmatprep.subr.bf16.mxu0 %v4547_v35  ;;  %v4078_v34 = vcombine.low %v227_v24, %v231_v28  ;;  %v4080_v35 = vcombine.low %v228_v29, %v232_v30  ;;  %v4089_v9 = vcombine.high %v236_v2, %v240_v32  ;;  %v275_v24 = vld [vmem:[#allocation7 + $0x210] sm:$0xff]  ;;  %v280_v29 = vld [vmem:[#allocation7 + $0x238] sm:$0xff] }
 0x196   :  { %3636 = vmatprep.subr.bf16.mxu1 %v4549_v36  ;;  %v4087_v36 = vcombine.high %v235_v63, %v239_v0  ;;  %v279_v28 = vld [vmem:[#allocation7 + $0x230] sm:$0xff] }
 0x198   :  { %3473 = vmatpush1.bf16.msra.mxu0 %v4546_v41  ;;  %v248_v41 = vld [vmem:[#allocation7 + $0x138] sm:$0xff] }
 0x199   :  { %3637 = vmatpush1.bf16.msra.mxu1 %v4548_v42  ;;  %3474 = vmatprep.subr.bf16.mxu0 %v4555_v43  ;;  %v4088_v42 = vcombine.low %v236_v2, %v240_v32  ;;  %v4095_v43 = vcombine.high %v243_v10, %v247_v38  ;;  %v288_v2 = vld [vmem:[#allocation7 + $0x278] sm:$0xff]  ;;  %v4126_v32 = vcombine.low %v275_v24, %v279_v28 }
 0x19a   :  { %3638 = vmatprep.subr.bf16.mxu1 %v4557_v44  ;;  %v4097_v44 = vcombine.high %v244_v39, %v248_v41 }
 0x19c   :  { %3475 = vmatpush1.bf16.msra.mxu0 %v4554_v53  ;;  %v4094_v53 = vcombine.low %v243_v10, %v247_v38  ;;  %v295_v10 = vld [vmem:[#allocation7 + $0x2b0] sm:$0xff]  ;;  %v292_v38 = vld [vmem:[#allocation7 + $0x298] sm:$0xff] }
 0x19d   :  { %3639 = vmatpush1.bf16.msra.mxu1 %v4556_v50  ;;  %3476 = vmatprep.subr.bf16.mxu0 %v4563_v54  ;;  %v4096_v50 = vcombine.low %v244_v39, %v248_v41  ;;  %v4103_v54 = vcombine.high %v251_v45, %v255_v46  ;;  %v296_v39 = vld [vmem:[#allocation7 + $0x2b8] sm:$0xff] }
 0x19e   :  { %3640 = vmatprep.subr.bf16.mxu1 %v4565_v55  ;;  %v4105_v55 = vcombine.high %v252_v47, %v256_v49 }
 0x1a0   :  { %3477 = vmatpush1.bf16.msra.mxu0 %v4562_v61  ;;  %v4102_v61 = vcombine.low %v251_v45, %v255_v46  ;;  %v303_v45 = vld [vmem:[#allocation7 + $0x2f0] sm:$0xff]  ;;  %v300_v46 = vld [vmem:[#allocation7 + $0x2d8] sm:$0xff] }
 0x1a1   :  { %3641 = vmatpush1.bf16.msra.mxu1 %v4564_v1  ;;  %3651 = vmatprep.subr.bf16.mxu0 %v4063_v4  ;;  %v4104_v1 = vcombine.low %v252_v47, %v256_v49  ;;  %v4113_v4 = vcombine.high %v260_v57, %v264_v58  ;;  %v304_v47 = vld [vmem:[#allocation7 + $0x2f8] sm:$0xff] }
 0x1a2   :  { %3815 = vmatprep.subr.bf16.mxu1 %v4065_v7  ;;  %v267_v7 = vld [vmem:[#allocation7 + $0x1d0] sm:$0xff]  ;;  %v312_v57 = vld [vmem:[#allocation7 + $0x338] sm:$0xff] }
 0x1a3   :  { %3479 = vmatmul.mubr.bf16.vlgmr.msra.gmra.mrb[0].mxu0 %v4966_v15  ;;  %v4118_v30 = vcombine.low %v267_v7, %v271_v8 }
 0x1a4   :  { %3643 = vmatmul.mubr.bf16.vlgmr.msra.gmra.mrb[0].mxu1 %v4966_v15  ;;  %3652 = vmatpush1.bf16.msra.mxu0 %v4062_v12  ;;  %v272_v12 = vld [vmem:[#allocation7 + $0x1f8] sm:$0xff] }
 0x1a5   :  { %3683 = vmatprep.mubr.bf16.mxu0 %v4920_v5  ;;  %3816 = vmatpush1.bf16.msra.mxu1 %v4064_v16  ;;  %v4119_v16 = vcombine.high %v267_v7, %v271_v8  ;;  %v319_v7 = vld [vmem:[#allocation7 + $0x370] sm:$0xff]  ;;  %v316_v8 = vld [vmem:[#allocation7 + $0x358] sm:$0xff] }
 0x1a6   :  { %3847 = vmatprep.mubr.bf16.mxu1 %v4920_v5  ;;  %3653 = vmatprep.subr.bf16.mxu0 %v4071_v22  ;;  %v4086_v5 = vcombine.low %v235_v63, %v239_v0  ;;  %v4121_v22 = vcombine.high %v268_v11, %v272_v12  ;;  %v287_v63 = vld [vmem:[#allocation7 + $0x270] sm:$0xff]  ;;  %v284_v0 = vld [vmem:[#allocation7 + $0x258] sm:$0xff] }
 0x1a7   :  { %3817 = vmatprep.subr.bf16.mxu1 %v4073_v27  ;;  %v276_v27 = vld [vmem:[#allocation7 + $0x218] sm:$0xff] }
 0x1a8   :  { %3654 = vmatpush1.bf16.msra.mxu0 %v4070_v31  ;;  %v4120_v31 = vcombine.low %v268_v11, %v272_v12  ;;  %v320_v11 = vld [vmem:[#allocation7 + $0x378] sm:$0xff] }
 0x1a9   :  { %3818 = vmatpush1.bf16.msra.mxu1 %v4072_v59  ;;  %3655 = vmatprep.subr.bf16.mxu0 %v4079_v60  ;;  %v4127_v59 = vcombine.high %v275_v24, %v279_v28  ;;  %v4129_v60 = vcombine.high %v276_v27, %v280_v29  ;;  %v327_v24 = vld [vmem:[#allocation7 + $0x3b0] sm:$0xff]  ;;  %v324_v28 = vld [vmem:[#allocation7 + $0x398] sm:$0xff] }
 0x1aa   :  { %3819 = vmatprep.subr.bf16.mxu1 %v4081_v62  ;;  %v283_v62 = vld [vmem:[#allocation7 + $0x250] sm:$0xff] }
 0x1ab   :  { %v4134_v41 = vcombine.low %v283_v62, %v287_v63 }
 0x1ac   :  { %3656 = vmatpush1.bf16.msra.mxu0 %v4078_v34  ;;  %v4128_v34 = vcombine.low %v276_v27, %v280_v29  ;;  %v328_v27 = vld [vmem:[#allocation7 + $0x3b8] sm:$0xff] }
 0x1ad   :  { %3820 = vmatpush1.bf16.msra.mxu1 %v4080_v35  ;;  %3657 = vmatprep.subr.bf16.mxu0 %v4087_v36  ;;  %v4135_v35 = vcombine.high %v283_v62, %v287_v63  ;;  %v4137_v36 = vcombine.high %v284_v0, %v288_v2  ;;  %v335_v62 = vld [vmem:[#allocation7 + $0x3f0] sm:$0xff]  ;;  %v332_v63 = vld [vmem:[#allocation7 + $0x3d8] sm:$0xff] }
 0x1ae   :  { %3821 = vmatprep.subr.bf16.mxu1 %v4089_v9  ;;  %v291_v9 = vld [vmem:[#allocation7 + $0x290] sm:$0xff] }
 0x1af   :  { %v4142_v49 = vcombine.low %v291_v9, %v295_v10 }
 0x1b0   :  { %3658 = vmatpush1.bf16.msra.mxu0 %v4086_v5  ;;  %v4136_v5 = vcombine.low %v284_v0, %v288_v2  ;;  %v336_v0 = vld [vmem:[#allocation7 + $0x3f8] sm:$0xff] }
 0x1b1   :  { %3822 = vmatpush1.bf16.msra.mxu1 %v4088_v42  ;;  %3659 = vmatprep.subr.bf16.mxu0 %v4095_v43  ;;  %v4143_v42 = vcombine.high %v291_v9, %v295_v10  ;;  %v4145_v43 = vcombine.high %v292_v38, %v296_v39  ;;  %v343_v9 = vld [vmem:[#allocation7 + $0x430] sm:$0xff]  ;;  %v340_v10 = vld [vmem:[#allocation7 + $0x418] sm:$0xff] }
 0x1b2   :  { %3823 = vmatprep.subr.bf16.mxu1 %v4097_v44  ;;  %v299_v44 = vld [vmem:[#allocation7 + $0x2d0] sm:$0xff] }
 0x1b3   :  { %v4150_v58 = vcombine.low %v299_v44, %v303_v45 }
 0x1b4   :  { %3660 = vmatpush1.bf16.msra.mxu0 %v4094_v53  ;;  %v4144_v53 = vcombine.low %v292_v38, %v296_v39  ;;  %v344_v38 = vld [vmem:[#allocation7 + $0x438] sm:$0xff] }
 0x1b5   :  { %3824 = vmatpush1.bf16.msra.mxu1 %v4096_v50  ;;  %3661 = vmatprep.subr.bf16.mxu0 %v4103_v54  ;;  %v4151_v50 = vcombine.high %v299_v44, %v303_v45  ;;  %v4153_v54 = vcombine.high %v300_v46, %v304_v47  ;;  %v351_v44 = vld [vmem:[#allocation7 + $0x470] sm:$0xff] }
 0x1b6   :  { %3825 = vmatprep.subr.bf16.mxu1 %v4105_v55  ;;  %v307_v55 = vld [vmem:[#allocation7 + $0x310] sm:$0xff] }
 0x1b7   :  { %v4158_v12 = vcombine.low %v307_v55, %v311_v51 }
 0x1b8   :  { %3662 = vmatpush1.bf16.msra.mxu0 %v4102_v61  ;;  %v4152_v61 = vcombine.low %v300_v46, %v304_v47  ;;  %v348_v46 = vld [vmem:[#allocation7 + $0x458] sm:$0xff] }
 0x1b9   :  { %3826 = vmatpush1.bf16.msra.mxu1 %v4104_v1  ;;  %3663 = vmatprep.subr.bf16.mxu0 %v4111_v3  ;;  %v4159_v1 = vcombine.high %v307_v55, %v311_v51  ;;  %v4161_v3 = vcombine.high %v308_v56, %v312_v57  ;;  %v352_v47 = vld [vmem:[#allocation7 + $0x478] sm:$0xff] }
 0x1ba   :  { %3827 = vmatprep.subr.bf16.mxu1 %v4113_v4  ;;  %v315_v4 = vld [vmem:[#allocation7 + $0x350] sm:$0xff]  ;;  %v4201_v55 = vcombine.high %v348_v46, %v352_v47  ;;  %v356_v51 = vld [vmem:[#allocation7 + $0x498] sm:$0xff] }
 0x1bb   :  { %v4166_v29 = vcombine.low %v315_v4, %v319_v7 }
 0x1bc   :  { %3664 = vmatpush1.bf16.msra.mxu0 %v4110_v13  ;;  %v4160_v13 = vcombine.low %v308_v56, %v312_v57  ;;  %v360_v56 = vld [vmem:[#allocation7 + $0x4b8] sm:$0xff] }
 0x1bd   :  { %3828 = vmatpush1.bf16.msra.mxu1 %v4112_v14  ;;  %3665 = vmatprep.subr.bf16.mxu0 %v4119_v16  ;;  %v4167_v14 = vcombine.high %v315_v4, %v319_v7  ;;  %v4169_v16 = vcombine.high %v316_v8, %v320_v11  ;;  %v367_v4 = vld [vmem:[#allocation7 + $0x4f0] sm:$0xff]  ;;  %v364_v7 = vld [vmem:[#allocation7 + $0x4d8] sm:$0xff] }
 0x1be   :  { %3829 = vmatprep.subr.bf16.mxu1 %v4121_v22  ;;  %v323_v22 = vld [vmem:[#allocation7 + $0x390] sm:$0xff] }
 0x1bf   :  { %v4174_v2 = vcombine.low %v323_v22, %v327_v24 }
 0x1c0   :  { %3666 = vmatpush1.bf16.msra.mxu0 %v4118_v30  ;;  %v4168_v30 = vcombine.low %v316_v8, %v320_v11  ;;  %v368_v8 = vld [vmem:[#allocation7 + $0x4f8] sm:$0xff] }
 0x1c1   :  { %3830 = vmatpush1.bf16.msra.mxu1 %v4120_v31  ;;  %3667 = vmatprep.subr.bf16.mxu0 %v4127_v59  ;;  %v4175_v31 = vcombine.high %v323_v22, %v327_v24  ;;  %v4177_v59 = vcombine.high %v324_v28, %v328_v27  ;;  %v372_v22 = vld [vmem:[#allocation7 + $0x518] sm:$0xff] }
 0x1c2   :  { %3831 = vmatprep.subr.bf16.mxu1 %v4129_v60  ;;  %v331_v60 = vld [vmem:[#allocation7 + $0x3d0] sm:$0xff]  ;;  %v376_v24 = vld [vmem:[#allocation7 + $0x538] sm:$0xff] }
 0x1c3   :  { %v4182_v39 = vcombine.low %v331_v60, %v335_v62 }
 0x1c4   :  { %3668 = vmatpush1.bf16.msra.mxu0 %v4126_v32  ;;  %v4176_v32 = vcombine.low %v324_v28, %v328_v27  ;;  %v4216_v28 = vcombine.low %v364_v7, %v368_v8 }
 0x1c5   :  { %3832 = vmatpush1.bf16.msra.mxu1 %v4128_v34  ;;  %3669 = vmatprep.subr.bf16.mxu0 %v4135_v35  ;;  %v4183_v34 = vcombine.high %v331_v60, %v335_v62  ;;  %v4185_v35 = vcombine.high %v332_v63, %v336_v0  ;;  %v384_v60 = vld [vmem:[#allocation7 + $0x578] sm:$0xff] }
 0x1c6   :  { %3833 = vmatprep.subr.bf16.mxu1 %v4137_v36  ;;  %v339_v36 = vld [vmem:[#allocation7 + $0x410] sm:$0xff] }
 0x1c7   :  { %v4190_v45 = vcombine.low %v339_v36, %v343_v9 }
 0x1c8   :  { %3670 = vmatpush1.bf16.msra.mxu0 %v4134_v41  ;;  %v4184_v41 = vcombine.low %v332_v63, %v336_v0  ;;  %v4224_v63 = vcombine.low %v372_v22, %v376_v24 }
 0x1c9   :  { %3834 = vmatpush1.bf16.msra.mxu1 %v4136_v5  ;;  %3671 = vmatprep.subr.bf16.mxu0 %v4143_v42  ;;  %v4191_v5 = vcombine.high %v339_v36, %v343_v9  ;;  %v4193_v42 = vcombine.high %v340_v10, %v344_v38  ;;  %v392_v36 = vld [vmem:[#allocation7 + $0x5b8] sm:$0xff] }
 0x1ca   :  { %3835 = vmatprep.subr.bf16.mxu1 %v4145_v43  ;;  %v347_v43 = vld [vmem:[#allocation7 + $0x450] sm:$0xff] }
 0x1cb   :  { %v4198_v57 = vcombine.low %v347_v43, %v351_v44 }
 0x1cc   :  { %3672 = vmatpush1.bf16.msra.mxu0 %v4142_v49  ;;  %v4192_v49 = vcombine.low %v340_v10, %v344_v38 }
 0x1cd   :  { %3836 = vmatpush1.bf16.msra.mxu1 %v4144_v53  ;;  %3673 = vmatprep.subr.bf16.mxu0 %v4151_v50  ;;  %v4199_v53 = vcombine.high %v347_v43, %v351_v44  ;;  %v355_v50 = vld [vmem:[#allocation7 + $0x490] sm:$0xff]  ;;  %v400_v43 = vld [vmem:[#allocation7 + $0x5f8] sm:$0xff] }
 0x1ce   :  { %3837 = vmatprep.subr.bf16.mxu1 %v4153_v54  ;;  %v359_v54 = vld [vmem:[#allocation7 + $0x4b0] sm:$0xff] }
 0x1cf   :  { %v4206_v11 = vcombine.low %v355_v50, %v359_v54 }
 0x1d0   :  { %3674 = vmatpush1.bf16.msra.mxu0 %v4150_v58  ;;  %v4200_v58 = vcombine.low %v348_v46, %v352_v47 }
 0x1d1   :  { %3838 = vmatpush1.bf16.msra.mxu1 %v4152_v61  ;;  %3675 = vmatprep.subr.bf16.mxu0 %v4159_v1  ;;  %v4207_v61 = vcombine.high %v355_v50, %v359_v54  ;;  %v4209_v1 = vcombine.high %v356_v51, %v360_v56  ;;  %v404_v50 = vld [vmem:[#allocation7 + $0x618] sm:$0xff] }
 0x1d2   :  { %3839 = vmatprep.subr.bf16.mxu1 %v4161_v3  ;;  %v363_v3 = vld [vmem:[#allocation7 + $0x4d0] sm:$0xff]  ;;  %v408_v54 = vld [vmem:[#allocation7 + $0x638] sm:$0xff] }
 0x1d4   :  { %3676 = vmatpush1.bf16.msra.mxu0 %v4158_v12  ;;  %v4215_v12 = vcombine.high %v363_v3, %v367_v4 }
 0x1d5   :  { %3840 = vmatpush1.bf16.msra.mxu1 %v4160_v13  ;;  %3677 = vmatprep.subr.bf16.mxu0 %v4167_v14  ;;  %v4217_v13 = vcombine.high %v364_v7, %v368_v8  ;;  %v371_v14 = vld [vmem:[#allocation7 + $0x510] sm:$0xff]  ;;  %v4256_v7 = vcombine.low %v404_v50, %v408_v54 }
 0x1d6   :  { %3841 = vmatprep.subr.bf16.mxu1 %v4169_v16  ;;  %v375_v16 = vld [vmem:[#allocation7 + $0x530] sm:$0xff] }
 0x1d7   :  { %v4223_v27 = vcombine.high %v371_v14, %v375_v16  ;;  %v4222_v62 = vcombine.low %v371_v14, %v375_v16  ;;  %v424_v14 = vld [vmem:[#allocation7 + $0x6b8] sm:$0xff] }
 0x1d8   :  { %3678 = vmatpush1.bf16.msra.mxu0 %v4166_v29  ;;  %v4225_v29 = vcombine.high %v372_v22, %v376_v24 }
 0x1d9   :  { %3842 = vmatpush1.bf16.msra.mxu1 %v4168_v30  ;;  %3679 = vmatprep.subr.bf16.mxu0 %v4175_v31  ;;  %v379_v30 = vld [vmem:[#allocation7 + $0x550] sm:$0xff] }
 0x1da   :  { %3843 = vmatprep.subr.bf16.mxu1 %v4177_v59  ;;  %v383_v31 = vld [vmem:[#allocation7 + $0x570] sm:$0xff]  ;;  %v380_v59 = vld [vmem:[#allocation7 + $0x558] sm:$0xff] }
 0x1db   :  { %v4231_v0 = vcombine.high %v379_v30, %v383_v31  ;;  %v4230_v9 = vcombine.low %v379_v30, %v383_v31  ;;  %v4232_v10 = vcombine.low %v380_v59, %v384_v60  ;;  %v432_v30 = vld [vmem:[#allocation7 + $0x6f8] sm:$0xff] }
 0x1dc   :  { %3680 = vmatpush1.bf16.msra.mxu0 %v4174_v2  ;;  %v4233_v2 = vcombine.high %v380_v59, %v384_v60 }
 0x1dd   :  { %3844 = vmatpush1.bf16.msra.mxu1 %v4176_v32  ;;  %3681 = vmatprep.subr.bf16.mxu0 %v4183_v34  ;;  %v387_v32 = vld [vmem:[#allocation7 + $0x590] sm:$0xff] }
 0x1de   :  { %3845 = vmatprep.subr.bf16.mxu1 %v4185_v35  ;;  %v391_v34 = vld [vmem:[#allocation7 + $0x5b0] sm:$0xff]  ;;  %v388_v35 = vld [vmem:[#allocation7 + $0x598] sm:$0xff] }
 0x1df   :  { %v4239_v38 = vcombine.high %v387_v32, %v391_v34  ;;  %v4238_v44 = vcombine.low %v387_v32, %v391_v34  ;;  %v440_v32 = vld [vmem:[#allocation7 + $0x738] sm:$0xff] }
 0x1e0   :  { %3682 = vmatpush1.bf16.msra.mxu0 %v4182_v39  ;;  %v4241_v39 = vcombine.high %v388_v35, %v392_v36 }
 0x1e1   :  { %3846 = vmatpush1.bf16.msra.mxu1 %v4184_v41  ;;  %3692 = vmatprep.subr.bf16.mxu0 %v4191_v5  ;;  %v395_v41 = vld [vmem:[#allocation7 + $0x5d0] sm:$0xff] }
 0x1e2   :  { %3856 = vmatprep.subr.bf16.mxu1 %v4193_v42  ;;  %v399_v5 = vld [vmem:[#allocation7 + $0x5f0] sm:$0xff]  ;;  %v396_v42 = vld [vmem:[#allocation7 + $0x5d8] sm:$0xff] }
 0x1e3   :  { %3684 = vmatmul.mubr.bf16.vlgmr.msra.gmra.mrb[4].mxu0 %v4922_v6  ;;  %v4247_v46 = vcombine.high %v395_v41, %v399_v5  ;;  %v4249_v47 = vcombine.high %v396_v42, %v400_v43 }
 0x1e4   :  { %3848 = vmatmul.mubr.bf16.vlgmr.msra.gmra.mrb[4].mxu1 %v4922_v6  ;;  %3693 = vmatpush1.bf16.msra.mxu0 %v4190_v45  ;;  %v4208_v6 = vcombine.low %v356_v51, %v360_v56  ;;  %v4240_v45 = vcombine.low %v388_v35, %v392_v36  ;;  %v4248_v51 = vcombine.low %v396_v42, %v400_v43 }
 0x1e5   :  { %3724 = vmatprep.mubr.bf16.mxu0 %v4933_v17  ;;  %3857 = vmatpush1.bf16.msra.mxu1 %v4192_v49  ;;  %v403_v49 = vld [vmem:[#allocation7 + $0x610] sm:$0xff] }
 0x1e6   :  { %3888 = vmatprep.mubr.bf16.mxu1 %v4933_v17  ;;  %3694 = vmatprep.subr.bf16.mxu0 %v4199_v53  ;;  %v4214_v17 = vcombine.low %v363_v3, %v367_v4  ;;  %v407_v53 = vld [vmem:[#allocation7 + $0x630] sm:$0xff]  ;;  %v416_v3 = vld [vmem:[#allocation7 + $0x678] sm:$0xff] }
 0x1e7   :  { %3858 = vmatprep.subr.bf16.mxu1 %v4201_v55  ;;  %v4246_v55 = vcombine.low %v395_v41, %v399_v5  ;;  %v4255_v56 = vcombine.high %v403_v49, %v407_v53  ;;  %v4254_v4 = vcombine.low %v403_v49, %v407_v53  ;;  %v448_v41 = vld [vmem:[#allocation7 + $0x778] sm:$0xff] }
 0x1e8   :  { %3695 = vmatpush1.bf16.msra.mxu0 %v4198_v57  ;;  %v4257_v57 = vcombine.high %v404_v50, %v408_v54  ;;  %v456_v49 = vld [vmem:[#allocation7 + $0x7b8] sm:$0xff] }
 0x1e9   :  { %3859 = vmatpush1.bf16.msra.mxu1 %v4200_v58  ;;  %3696 = vmatprep.subr.bf16.mxu0 %v4207_v61  ;;  %v411_v58 = vld [vmem:[#allocation7 + $0x650] sm:$0xff] }
 0x1ea   :  { %3860 = vmatprep.subr.bf16.mxu1 %v4209_v1  ;;  %v415_v61 = vld [vmem:[#allocation7 + $0x670] sm:$0xff]  ;;  %v412_v1 = vld [vmem:[#allocation7 + $0x658] sm:$0xff] }
 0x1eb   :  { %v4263_v8 = vcombine.high %v411_v58, %v415_v61  ;;  %v4262_v16 = vcombine.low %v411_v58, %v415_v61  ;;  %v4264_v22 = vcombine.low %v412_v1, %v416_v3  ;;  %v464_v58 = vld [vmem:[#allocation7 + $0x7f8] sm:$0xff] }
 0x1ec   :  { %3697 = vmatpush1.bf16.msra.mxu0 %v4206_v11  ;;  %v4265_v11 = vcombine.high %v412_v1, %v416_v3 }
 0x1ed   :  { %3861 = vmatpush1.bf16.msra.mxu1 %v4208_v6  ;;  %3698 = vmatprep.subr.bf16.mxu0 %v4215_v12  ;;  %v419_v6 = vld [vmem:[#allocation7 + $0x690] sm:$0xff] }
 0x1ee   :  { %3862 = vmatprep.subr.bf16.mxu1 %v4217_v13  ;;  %v423_v12 = vld [vmem:[#allocation7 + $0x6b0] sm:$0xff]  ;;  %v420_v13 = vld [vmem:[#allocation7 + $0x698] sm:$0xff] }
 0x1ef   :  { %v4271_v24 = vcombine.high %v419_v6, %v423_v12  ;;  %v4270_v31 = vcombine.low %v419_v6, %v423_v12  ;;  %v4272_v59 = vcombine.low %v420_v13, %v424_v14  ;;  %v472_v6 = vld [vmem:[#allocation7 + $0x838] sm:$0xff] }
 0x1f0   :  { %3699 = vmatpush1.bf16.msra.mxu0 %v4214_v17  ;;  %v4273_v17 = vcombine.high %v420_v13, %v424_v14 }
 0x1f1   :  { %3863 = vmatpush1.bf16.msra.mxu1 %v4216_v28  ;;  %3700 = vmatprep.subr.bf16.mxu0 %v4223_v27  ;;  %v427_v28 = vld [vmem:[#allocation7 + $0x6d0] sm:$0xff] }
 0x1f2   :  { %3864 = vmatprep.subr.bf16.mxu1 %v4225_v29  ;;  %v431_v27 = vld [vmem:[#allocation7 + $0x6f0] sm:$0xff]  ;;  %v428_v29 = vld [vmem:[#allocation7 + $0x6d8] sm:$0xff] }
 0x1f3   :  { %v4279_v60 = vcombine.high %v427_v28, %v431_v27  ;;  %v4278_v34 = vcombine.low %v427_v28, %v431_v27  ;;  %v4280_v35 = vcombine.low %v428_v29, %v432_v30  ;;  %v476_v28 = vld [vmem:[#allocation7 + $0x858] sm:$0xff] }
 0x1f4   :  { %3701 = vmatpush1.bf16.msra.mxu0 %v4222_v62  ;;  %v4281_v62 = vcombine.high %v428_v29, %v432_v30  ;;  %v480_v27 = vld [vmem:[#allocation7 + $0x878] sm:$0xff] }
 0x1f5   :  { %3865 = vmatpush1.bf16.msra.mxu1 %v4224_v63  ;;  %3702 = vmatprep.subr.bf16.mxu0 %v4231_v0  ;;  %v435_v63 = vld [vmem:[#allocation7 + $0x710] sm:$0xff] }
 0x1f6   :  { %3866 = vmatprep.subr.bf16.mxu1 %v4233_v2  ;;  %v439_v0 = vld [vmem:[#allocation7 + $0x730] sm:$0xff]  ;;  %v436_v2 = vld [vmem:[#allocation7 + $0x718] sm:$0xff] }
 0x1f7   :  { %v4287_v36 = vcombine.high %v435_v63, %v439_v0  ;;  %v4286_v5 = vcombine.low %v435_v63, %v439_v0  ;;  %v4288_v42 = vcombine.low %v436_v2, %v440_v32  ;;  %v488_v63 = vld [vmem:[#allocation7 + $0x8b8] sm:$0xff] }
 0x1f8   :  { %3703 = vmatpush1.bf16.msra.mxu0 %v4230_v9  ;;  %v4289_v9 = vcombine.high %v436_v2, %v440_v32  ;;  %v4328_v2 = vcombine.low %v476_v28, %v480_v27 }
 0x1f9   :  { %3867 = vmatpush1.bf16.msra.mxu1 %v4232_v10  ;;  %3704 = vmatprep.subr.bf16.mxu0 %v4239_v38  ;;  %v443_v10 = vld [vmem:[#allocation7 + $0x750] sm:$0xff] }
 0x1fa   :  { %3868 = vmatprep.subr.bf16.mxu1 %v4241_v39  ;;  %v447_v38 = vld [vmem:[#allocation7 + $0x770] sm:$0xff]  ;;  %v444_v39 = vld [vmem:[#allocation7 + $0x758] sm:$0xff] }
 0x1fb   :  { %v4295_v43 = vcombine.high %v443_v10, %v447_v38  ;;  %v4294_v53 = vcombine.low %v443_v10, %v447_v38  ;;  %v4296_v50 = vcombine.low %v444_v39, %v448_v41  ;;  %v496_v10 = vld [vmem:[#allocation7 + $0x8f8] sm:$0xff] }
 0x1fc   :  { %3705 = vmatpush1.bf16.msra.mxu0 %v4238_v44  ;;  %v4297_v44 = vcombine.high %v444_v39, %v448_v41 }
 0x1fd   :  { %3869 = vmatpush1.bf16.msra.mxu1 %v4240_v45  ;;  %3706 = vmatprep.subr.bf16.mxu0 %v4247_v46  ;;  %v451_v45 = vld [vmem:[#allocation7 + $0x790] sm:$0xff] }
 0x1fe   :  { %3870 = vmatprep.subr.bf16.mxu1 %v4249_v47  ;;  %v455_v46 = vld [vmem:[#allocation7 + $0x7b0] sm:$0xff]  ;;  %v452_v47 = vld [vmem:[#allocation7 + $0x798] sm:$0xff] }
 0x1ff   :  { %v4303_v54 = vcombine.high %v451_v45, %v455_v46  ;;  %v4302_v61 = vcombine.low %v451_v45, %v455_v46  ;;  %v4304_v1 = vcombine.low %v452_v47, %v456_v49 }
 0x200   :  { %3707 = vmatpush1.bf16.msra.mxu0 %v4246_v55  ;;  %v4305_v55 = vcombine.high %v452_v47, %v456_v49  ;;  %v507_v49 = vld [vmem:[#allocation7 + $0x950] sm:$0xff] }
 0x201   :  { %3871 = vmatpush1.bf16.msra.mxu1 %v4248_v51  ;;  %3708 = vmatprep.subr.bf16.mxu0 %v4255_v56  ;;  %v459_v51 = vld [vmem:[#allocation7 + $0x7d0] sm:$0xff] }
 0x202   :  { %3872 = vmatprep.subr.bf16.mxu1 %v4257_v57  ;;  %v463_v56 = vld [vmem:[#allocation7 + $0x7f0] sm:$0xff]  ;;  %v460_v57 = vld [vmem:[#allocation7 + $0x7d8] sm:$0xff] }
 0x203   :  { %v4311_v3 = vcombine.high %v459_v51, %v463_v56  ;;  %v4310_v12 = vcombine.low %v459_v51, %v463_v56  ;;  %v4312_v13 = vcombine.low %v460_v57, %v464_v58 }
 0x204   :  { %3709 = vmatpush1.bf16.msra.mxu0 %v4254_v4  ;;  %v4313_v4 = vcombine.high %v460_v57, %v464_v58  ;;  %v515_v58 = vld [vmem:[#allocation7 + $0x990] sm:$0xff] }
 0x205   :  { %3873 = vmatpush1.bf16.msra.mxu1 %v4256_v7  ;;  %3710 = vmatprep.subr.bf16.mxu0 %v4263_v8  ;;  %v467_v7 = vld [vmem:[#allocation7 + $0x810] sm:$0xff] }
 0x206   :  { %3874 = vmatprep.subr.bf16.mxu1 %v4265_v11  ;;  %v471_v8 = vld [vmem:[#allocation7 + $0x830] sm:$0xff]  ;;  %v468_v11 = vld [vmem:[#allocation7 + $0x818] sm:$0xff] }
 0x207   :  { %v4319_v14 = vcombine.high %v467_v7, %v471_v8  ;;  %v4320_v29 = vcombine.low %v468_v11, %v472_v6 }
 0x208   :  { %3711 = vmatpush1.bf16.msra.mxu0 %v4262_v16  ;;  %v4321_v16 = vcombine.high %v468_v11, %v472_v6  ;;  %v523_v6 = vld [vmem:[#allocation7 + $0x9d0] sm:$0xff] }
 0x209   :  { %3875 = vmatpush1.bf16.msra.mxu1 %v4264_v22  ;;  %3712 = vmatprep.subr.bf16.mxu0 %v4271_v24  ;;  %v475_v22 = vld [vmem:[#allocation7 + $0x850] sm:$0xff] }
 0x20a   :  { %3876 = vmatprep.subr.bf16.mxu1 %v4273_v17  ;;  %v479_v24 = vld [vmem:[#allocation7 + $0x870] sm:$0xff]  ;;  %v4318_v17 = vcombine.low %v467_v7, %v471_v8 }
 0x20b   :  { %v4327_v30 = vcombine.high %v475_v22, %v479_v24  ;;  %v4326_v0 = vcombine.low %v475_v22, %v479_v24 }
 0x20c   :  { %3713 = vmatpush1.bf16.msra.mxu0 %v4270_v31  ;;  %v483_v31 = vld [vmem:[#allocation7 + $0x890] sm:$0xff] }
 0x20d   :  { %3877 = vmatpush1.bf16.msra.mxu1 %v4272_v59  ;;  %3714 = vmatprep.subr.bf16.mxu0 %v4279_v60  ;;  %v487_v59 = vld [vmem:[#allocation7 + $0x8b0] sm:$0xff]  ;;  %v4329_v60 = vcombine.high %v476_v28, %v480_v27 }
 0x20e   :  { %3878 = vmatprep.subr.bf16.mxu1 %v4281_v62  ;;  %v484_v62 = vld [vmem:[#allocation7 + $0x898] sm:$0xff]  ;;  %v4335_v32 = vcombine.high %v483_v31, %v487_v59  ;;  %v4334_v38 = vcombine.low %v483_v31, %v487_v59  ;;  %v531_v28 = vld [vmem:[#allocation7 + $0xa10] sm:$0xff] }
 0x20f   :  { %v535_v27 = vld [vmem:[#allocation7 + $0xa30] sm:$0xff] }
 0x210   :  { %3715 = vmatpush1.bf16.msra.mxu0 %v4278_v34  ;;  %v4337_v34 = vcombine.high %v484_v62, %v488_v63 }
 0x211   :  { %3879 = vmatpush1.bf16.msra.mxu1 %v4280_v35  ;;  %3716 = vmatprep.subr.bf16.mxu0 %v4287_v36  ;;  %v491_v35 = vld [vmem:[#allocation7 + $0x8d0] sm:$0xff] }
 0x212   :  { %3880 = vmatprep.subr.bf16.mxu1 %v4289_v9  ;;  %v495_v36 = vld [vmem:[#allocation7 + $0x8f0] sm:$0xff]  ;;  %v492_v9 = vld [vmem:[#allocation7 + $0x8d8] sm:$0xff] }
 0x213   :  { %v4343_v39 = vcombine.high %v491_v35, %v495_v36  ;;  %v4345_v41 = vcombine.high %v492_v9, %v496_v10  ;;  %v4344_v45 = vcombine.low %v492_v9, %v496_v10  ;;  %v547_v10 = vld [vmem:[#allocation7 + $0xa90] sm:$0xff] }
 0x214   :  { %3717 = vmatpush1.bf16.msra.mxu0 %v4286_v5  ;;  %v499_v5 = vld [vmem:[#allocation7 + $0x910] sm:$0xff] }
 0x215   :  { %3881 = vmatpush1.bf16.msra.mxu1 %v4288_v42  ;;  %3718 = vmatprep.subr.bf16.mxu0 %v4295_v43  ;;  %v503_v42 = vld [vmem:[#allocation7 + $0x930] sm:$0xff]  ;;  %v500_v43 = vld [vmem:[#allocation7 + $0x918] sm:$0xff] }
 0x216   :  { %3882 = vmatprep.subr.bf16.mxu1 %v4297_v44  ;;  %v504_v44 = vld [vmem:[#allocation7 + $0x938] sm:$0xff]  ;;  %v4351_v46 = vcombine.high %v499_v5, %v503_v42 }
 0x217   :  { %v4353_v47 = vcombine.high %v500_v43, %v504_v44  ;;  %v4352_v51 = vcombine.low %v500_v43, %v504_v44  ;;  %v555_v44 = vld [vmem:[#allocation7 + $0xad0] sm:$0xff] }
 0x218   :  { %3719 = vmatpush1.bf16.msra.mxu0 %v4294_v53  ;;  %v511_v53 = vld [vmem:[#allocation7 + $0x970] sm:$0xff] }
 0x219   :  { %3883 = vmatpush1.bf16.msra.mxu1 %v4296_v50  ;;  %3720 = vmatprep.subr.bf16.mxu0 %v4303_v54  ;;  %v508_v50 = vld [vmem:[#allocation7 + $0x958] sm:$0xff]  ;;  %v4359_v56 = vcombine.high %v507_v49, %v511_v53 }
 0x21a   :  { %3884 = vmatprep.subr.bf16.mxu1 %v4305_v55  ;;  %v512_v54 = vld [vmem:[#allocation7 + $0x978] sm:$0xff]  ;;  %v4350_v55 = vcombine.low %v499_v5, %v503_v42 }
 0x21b   :  { %v4361_v57 = vcombine.high %v508_v50, %v512_v54  ;;  %v4360_v7 = vcombine.low %v508_v50, %v512_v54  ;;  %v563_v54 = vld [vmem:[#allocation7 + $0xb10] sm:$0xff] }
 0x21c   :  { %3721 = vmatpush1.bf16.msra.mxu0 %v4302_v61  ;;  %v519_v61 = vld [vmem:[#allocation7 + $0x9b0] sm:$0xff] }
 0x21d   :  { %3885 = vmatpush1.bf16.msra.mxu1 %v4304_v1  ;;  %3722 = vmatprep.subr.bf16.mxu0 %v4311_v3  ;;  %v516_v1 = vld [vmem:[#allocation7 + $0x998] sm:$0xff]  ;;  %v4367_v8 = vcombine.high %v515_v58, %v519_v61 }
 0x21e   :  { %3886 = vmatprep.subr.bf16.mxu1 %v4313_v4  ;;  %v520_v3 = vld [vmem:[#allocation7 + $0x9b8] sm:$0xff]  ;;  %v4358_v4 = vcombine.low %v507_v49, %v511_v53 }
 0x21f   :  { %v4369_v11 = vcombine.high %v516_v1, %v520_v3  ;;  %v4368_v22 = vcombine.low %v516_v1, %v520_v3  ;;  %v571_v3 = vld [vmem:[#allocation7 + $0xb50] sm:$0xff] }
 0x220   :  { %3723 = vmatpush1.bf16.msra.mxu0 %v4310_v12  ;;  %v527_v12 = vld [vmem:[#allocation7 + $0x9f0] sm:$0xff] }
 0x221   :  { %3887 = vmatpush1.bf16.msra.mxu1 %v4312_v13  ;;  %3733 = vmatprep.subr.bf16.mxu0 %v4319_v14  ;;  %v524_v13 = vld [vmem:[#allocation7 + $0x9d8] sm:$0xff]  ;;  %v4375_v24 = vcombine.high %v523_v6, %v527_v12  ;;  %v4374_v31 = vcombine.low %v523_v6, %v527_v12 }
 0x222   :  { %3897 = vmatprep.subr.bf16.mxu1 %v4321_v16  ;;  %v528_v14 = vld [vmem:[#allocation7 + $0x9f8] sm:$0xff]  ;;  %v4366_v16 = vcombine.low %v515_v58, %v519_v61 }
 0x223   :  { %3725 = vmatmul.mubr.bf16.vlgmr.msra.gmra.mrb[4].mxu0 %v4947_v48  ;;  %v4376_v59 = vcombine.low %v524_v13, %v528_v14 }
 0x224   :  { %3889 = vmatmul.mubr.bf16.vlgmr.msra.gmra.mrb[4].mxu1 %v4947_v48  ;;  %3734 = vmatpush1.bf16.msra.mxu0 %v4318_v17  ;;  %v4336_v48 = vcombine.low %v484_v62, %v488_v63  ;;  %v4377_v17 = vcombine.high %v524_v13, %v528_v14  ;;  %v539_v63 = vld [vmem:[#allocation7 + $0xa50] sm:$0xff] }
 0x225   :  { %3765 = vmatprep.mubr.bf16.mxu0 %v4949_v52  ;;  %3898 = vmatpush1.bf16.msra.mxu1 %v4320_v29  ;;  %v532_v29 = vld [vmem:[#allocation7 + $0xa18] sm:$0xff]  ;;  %v579_v14 = vld [vmem:[#allocation7 + $0xb90] sm:$0xff] }
 0x226   :  { %3929 = vmatprep.mubr.bf16.mxu1 %v4949_v52  ;;  %3735 = vmatprep.subr.bf16.mxu0 %v4327_v30  ;;  %v4342_v52 = vcombine.low %v491_v35, %v495_v36  ;;  %v536_v30 = vld [vmem:[#allocation7 + $0xa38] sm:$0xff] }
 0x227   :  { %3899 = vmatprep.subr.bf16.mxu1 %v4329_v60  ;;  %v4383_v60 = vcombine.high %v531_v28, %v535_v27  ;;  %v4385_v62 = vcombine.high %v532_v29, %v536_v30  ;;  %v4384_v35 = vcombine.low %v532_v29, %v536_v30  ;;  %v587_v30 = vld [vmem:[#allocation7 + $0xbd0] sm:$0xff] }
 0x228   :  { %3736 = vmatpush1.bf16.msra.mxu0 %v4326_v0  ;;  %v543_v0 = vld [vmem:[#allocation7 + $0xa70] sm:$0xff] }
 0x229   :  { %3900 = vmatpush1.bf16.msra.mxu1 %v4328_v2  ;;  %3737 = vmatprep.subr.bf16.mxu0 %v4335_v32  ;;  %v540_v2 = vld [vmem:[#allocation7 + $0xa58] sm:$0xff]  ;;  %v4391_v36 = vcombine.high %v539_v63, %v543_v0 }
 0x22a   :  { %3901 = vmatprep.subr.bf16.mxu1 %v4337_v34  ;;  %v544_v32 = vld [vmem:[#allocation7 + $0xa78] sm:$0xff]  ;;  %v4382_v34 = vcombine.low %v531_v28, %v535_v27 }
 0x22b   :  { %v4393_v9 = vcombine.high %v540_v2, %v544_v32  ;;  %v4392_v5 = vcombine.low %v540_v2, %v544_v32  ;;  %v595_v32 = vld [vmem:[#allocation7 + $0xc10] sm:$0xff] }
 0x22c   :  { %3738 = vmatpush1.bf16.msra.mxu0 %v4334_v38  ;;  %v551_v38 = vld [vmem:[#allocation7 + $0xab0] sm:$0xff] }
 0x22d   :  { %3902 = vmatpush1.bf16.msra.mxu1 %v4336_v48  ;;  %3739 = vmatprep.subr.bf16.mxu0 %v4343_v39  ;;  %v548_v48 = vld [vmem:[#allocation7 + $0xa98] sm:$0xff]  ;;  %v4399_v42 = vcombine.high %v547_v10, %v551_v38 }
 0x22e   :  { %3903 = vmatprep.subr.bf16.mxu1 %v4345_v41  ;;  %v552_v39 = vld [vmem:[#allocation7 + $0xab8] sm:$0xff]  ;;  %v4390_v41 = vcombine.low %v539_v63, %v543_v0 }
 0x22f   :  { %v4401_v43 = vcombine.high %v548_v48, %v552_v39  ;;  %v4400_v49 = vcombine.low %v548_v48, %v552_v39  ;;  %v603_v39 = vld [vmem:[#allocation7 + $0xc50] sm:$0xff] }
 0x230   :  { %3740 = vmatpush1.bf16.msra.mxu0 %v4342_v52  ;;  %v559_v52 = vld [vmem:[#allocation7 + $0xaf0] sm:$0xff] }
 0x231   :  { %3904 = vmatpush1.bf16.msra.mxu1 %v4344_v45  ;;  %3741 = vmatprep.subr.bf16.mxu0 %v4351_v46  ;;  %v556_v45 = vld [vmem:[#allocation7 + $0xad8] sm:$0xff]  ;;  %v4407_v53 = vcombine.high %v555_v44, %v559_v52 }
 0x232   :  { %3905 = vmatprep.subr.bf16.mxu1 %v4353_v47  ;;  %v560_v46 = vld [vmem:[#allocation7 + $0xaf8] sm:$0xff]  ;;  %v4398_v47 = vcombine.low %v547_v10, %v551_v38 }
 0x233   :  { %v4409_v50 = vcombine.high %v556_v45, %v560_v46  ;;  %v4408_v58 = vcombine.low %v556_v45, %v560_v46  ;;  %v611_v45 = vld [vmem:[#allocation7 + $0xc90] sm:$0xff] }
 0x234   :  { %3742 = vmatpush1.bf16.msra.mxu0 %v4350_v55  ;;  %v567_v55 = vld [vmem:[#allocation7 + $0xb30] sm:$0xff] }
 0x235   :  { %3906 = vmatpush1.bf16.msra.mxu1 %v4352_v51  ;;  %3743 = vmatprep.subr.bf16.mxu0 %v4359_v56  ;;  %v564_v51 = vld [vmem:[#allocation7 + $0xb18] sm:$0xff]  ;;  %v4415_v61 = vcombine.high %v563_v54, %v567_v55  ;;  %v615_v46 = vld [vmem:[#allocation7 + $0xcb0] sm:$0xff] }
 0x236   :  { %3907 = vmatprep.subr.bf16.mxu1 %v4361_v57  ;;  %v568_v56 = vld [vmem:[#allocation7 + $0xb38] sm:$0xff]  ;;  %v4406_v57 = vcombine.low %v555_v44, %v559_v52 }
 0x237   :  { %v4417_v1 = vcombine.high %v564_v51, %v568_v56  ;;  %v4416_v6 = vcombine.low %v564_v51, %v568_v56  ;;  %v619_v56 = vld [vmem:[#allocation7 + $0xcd0] sm:$0xff] }
 0x238   :  { %3744 = vmatpush1.bf16.msra.mxu0 %v4358_v4  ;;  %v575_v4 = vld [vmem:[#allocation7 + $0xb70] sm:$0xff] }
 0x239   :  { %3908 = vmatpush1.bf16.msra.mxu1 %v4360_v7  ;;  %3745 = vmatprep.subr.bf16.mxu0 %v4367_v8  ;;  %v572_v7 = vld [vmem:[#allocation7 + $0xb58] sm:$0xff]  ;;  %v4423_v12 = vcombine.high %v571_v3, %v575_v4 }
 0x23a   :  { %3909 = vmatprep.subr.bf16.mxu1 %v4369_v11  ;;  %v576_v8 = vld [vmem:[#allocation7 + $0xb78] sm:$0xff]  ;;  %v4414_v11 = vcombine.low %v563_v54, %v567_v55  ;;  %v4463_v55 = vcombine.high %v611_v45, %v615_v46 }
 0x23b   :  { %v4425_v13 = vcombine.high %v572_v7, %v576_v8  ;;  %v4424_v28 = vcombine.low %v572_v7, %v576_v8  ;;  %v627_v7 = vld [vmem:[#allocation7 + $0xd10] sm:$0xff] }
 0x23c   :  { %3746 = vmatpush1.bf16.msra.mxu0 %v4366_v16  ;;  %v583_v16 = vld [vmem:[#allocation7 + $0xbb0] sm:$0xff] }
 0x23d   :  { %3910 = vmatpush1.bf16.msra.mxu1 %v4368_v22  ;;  %3747 = vmatprep.subr.bf16.mxu0 %v4375_v24  ;;  %v580_v22 = vld [vmem:[#allocation7 + $0xb98] sm:$0xff]  ;;  %v4431_v27 = vcombine.high %v579_v14, %v583_v16  ;;  %v631_v8 = vld [vmem:[#allocation7 + $0xd30] sm:$0xff] }
 0x23e   :  { %3911 = vmatprep.subr.bf16.mxu1 %v4377_v17  ;;  %v584_v24 = vld [vmem:[#allocation7 + $0xbb8] sm:$0xff]  ;;  %v4422_v17 = vcombine.low %v571_v3, %v575_v4 }
 0x23f   :  { %v4433_v29 = vcombine.high %v580_v22, %v584_v24  ;;  %v4432_v63 = vcombine.low %v580_v22, %v584_v24  ;;  %v639_v22 = vld [vmem:[#allocation7 + $0xd70] sm:$0xff]  ;;  %v636_v24 = vld [vmem:[#allocation7 + $0xd58] sm:$0xff] }
 0x240   :  { %3748 = vmatpush1.bf16.msra.mxu0 %v4374_v31  ;;  %v591_v31 = vld [vmem:[#allocation7 + $0xbf0] sm:$0xff] }
 0x241   :  { %3912 = vmatpush1.bf16.msra.mxu1 %v4376_v59  ;;  %3749 = vmatprep.subr.bf16.mxu0 %v4383_v60  ;;  %v588_v59 = vld [vmem:[#allocation7 + $0xbd8] sm:$0xff]  ;;  %v4439_v0 = vcombine.high %v587_v30, %v591_v31 }
 0x242   :  { %3913 = vmatprep.subr.bf16.mxu1 %v4385_v62  ;;  %v592_v60 = vld [vmem:[#allocation7 + $0xbf8] sm:$0xff]  ;;  %v4430_v62 = vcombine.low %v579_v14, %v583_v16  ;;  %v635_v16 = vld [vmem:[#allocation7 + $0xd50] sm:$0xff] }
 0x243   :  { %v4441_v2 = vcombine.high %v588_v59, %v592_v60  ;;  %v4440_v10 = vcombine.low %v588_v59, %v592_v60  ;;  %v643_v59 = vld [vmem:[#allocation7 + $0xd90] sm:$0xff] }
 0x244   :  { %3750 = vmatpush1.bf16.msra.mxu0 %v4382_v34  ;;  %v599_v34 = vld [vmem:[#allocation7 + $0xc30] sm:$0xff] }
 0x245   :  { %3914 = vmatpush1.bf16.msra.mxu1 %v4384_v35  ;;  %3751 = vmatprep.subr.bf16.mxu0 %v4391_v36  ;;  %v596_v35 = vld [vmem:[#allocation7 + $0xc18] sm:$0xff]  ;;  %v4447_v38 = vcombine.high %v595_v32, %v599_v34  ;;  %v647_v60 = vld [vmem:[#allocation7 + $0xdb0] sm:$0xff] }
 0x246   :  { %3915 = vmatprep.subr.bf16.mxu1 %v4393_v9  ;;  %v600_v36 = vld [vmem:[#allocation7 + $0xc38] sm:$0xff]  ;;  %v4438_v9 = vcombine.low %v587_v30, %v591_v31  ;;  %v4487_v30 = vcombine.high %v635_v16, %v639_v22 }
 0x247   :  { %v4449_v48 = vcombine.high %v596_v35, %v600_v36  ;;  %v4448_v44 = vcombine.low %v596_v35, %v600_v36  ;;  %v4486_v35 = vcombine.low %v635_v16, %v639_v22 }
 0x248   :  { %3752 = vmatpush1.bf16.msra.mxu0 %v4390_v41  ;;  %v607_v41 = vld [vmem:[#allocation7 + $0xc70] sm:$0xff] }
 0x249   :  { %3916 = vmatpush1.bf16.msra.mxu1 %v4392_v5  ;;  %3753 = vmatprep.subr.bf16.mxu0 %v4399_v42  ;;  %v4446_v5 = vcombine.low %v595_v32, %v599_v34  ;;  %v604_v42 = vld [vmem:[#allocation7 + $0xc58] sm:$0xff]  ;;  %v4455_v52 = vcombine.high %v603_v39, %v607_v41 }
 0x24a   :  { %3917 = vmatprep.subr.bf16.mxu1 %v4401_v43  ;;  %v608_v43 = vld [vmem:[#allocation7 + $0xc78] sm:$0xff] }
 0x24b   :  { %v4456_v54 = vcombine.low %v604_v42, %v608_v43 }
 0x24c   :  { %3754 = vmatpush1.bf16.msra.mxu0 %v4398_v47  ;;  %v4457_v47 = vcombine.high %v604_v42, %v608_v43 }
 0x24d   :  { %3918 = vmatpush1.bf16.msra.mxu1 %v4400_v49  ;;  %3755 = vmatprep.subr.bf16.mxu0 %v4407_v53  ;;  %v612_v49 = vld [vmem:[#allocation7 + $0xc98] sm:$0xff] }
 0x24e   :  { %3919 = vmatprep.subr.bf16.mxu1 %v4409_v50  ;;  %v616_v53 = vld [vmem:[#allocation7 + $0xcb8] sm:$0xff]  ;;  %v4454_v50 = vcombine.low %v603_v39, %v607_v41  ;;  %v651_v39 = vld [vmem:[#allocation7 + $0xdd0] sm:$0xff] }
 0x24f   :  { %v4465_v51 = vcombine.high %v612_v49, %v616_v53  ;;  %v655_v41 = vld [vmem:[#allocation7 + $0xdf0] sm:$0xff] }
 0x250   :  { %3756 = vmatpush1.bf16.msra.mxu0 %v4406_v57  ;;  %v623_v57 = vld [vmem:[#allocation7 + $0xcf0] sm:$0xff] }
 0x251   :  { %3920 = vmatpush1.bf16.msra.mxu1 %v4408_v58  ;;  %3757 = vmatprep.subr.bf16.mxu0 %v4415_v61  ;;  %v620_v58 = vld [vmem:[#allocation7 + $0xcd8] sm:$0xff]  ;;  %v4471_v3 = vcombine.high %v619_v56, %v623_v57 }
 0x252   :  { %3921 = vmatprep.subr.bf16.mxu1 %v4417_v1  ;;  %v624_v61 = vld [vmem:[#allocation7 + $0xcf8] sm:$0xff]  ;;  %v4462_v1 = vcombine.low %v611_v45, %v615_v46 }
 0x253   :  { %v4473_v4 = vcombine.high %v620_v58, %v624_v61  ;;  %v656_v45 = vld [vmem:[#allocation7 + $0xdf8] sm:$0xff] }
 0x254   :  { %3758 = vmatpush1.bf16.msra.mxu0 %v4414_v11  ;;  %v628_v11 = vld [vmem:[#allocation7 + $0xd18] sm:$0xff] }
 0x255   :  { %3922 = vmatpush1.bf16.msra.mxu1 %v4416_v6  ;;  %3759 = vmatprep.subr.bf16.mxu0 %v4423_v12  ;;  %v632_v6 = vld [vmem:[#allocation7 + $0xd38] sm:$0xff]  ;;  %v4472_v12 = vcombine.low %v620_v58, %v624_v61  ;;  %v4503_v58 = vcombine.high %v651_v39, %v655_v41 }
 0x256   :  { %3923 = vmatprep.subr.bf16.mxu1 %v4425_v13  ;;  %v4479_v13 = vcombine.high %v627_v7, %v631_v8  ;;  %v4481_v14 = vcombine.high %v628_v11, %v632_v6 }
 0x258   :  { %3760 = vmatpush1.bf16.msra.mxu0 %v4422_v17  ;;  %v640_v17 = vld [vmem:[#allocation7 + $0xd78] sm:$0xff] }
 0x259   :  { %3924 = vmatpush1.bf16.msra.mxu1 %v4424_v28  ;;  %3761 = vmatprep.subr.bf16.mxu0 %v4431_v27  ;;  %v4478_v28 = vcombine.low %v627_v7, %v631_v8  ;;  %v4984_v27 = vld [vmem:[#allocation8] sm:$0xff]  ;;  %v4489_v31 = vcombine.high %v636_v24, %v640_v17  ;;  %v663_v7 = vld [vmem:[#allocation7 + $0xe30] sm:$0xff] }
 0x25a   :  { %3925 = vmatprep.subr.bf16.mxu1 %v4433_v29  ;;  %v4480_v29 = vcombine.low %v628_v11, %v632_v6  ;;  %v734_v32 = vrot.slane %v4984_v27, %v4891_v21  ;;  %v730_v34 = vrot.slane %v4984_v27, %v4885_v18  ;;  %v738_v36 = vrot.slane %v4984_v27, %v4889_v20  ;;  %v660_v11 = vld [vmem:[#allocation7 + $0xe18] sm:$0xff] }
 0x25b   :  { %v664_v6 = vld [vmem:[#allocation7 + $0xe38] sm:$0xff] }
 0x25c   :  { %3762 = vmatpush1.bf16.msra.mxu0 %v4430_v62  ;;  %v726_v62 = vrot.slane %v4984_v27, %v4887_v19 }
 0x25d   :  { %3926 = vmatpush1.bf16.msra.mxu1 %v4432_v63  ;;  %3763 = vmatprep.subr.bf16.mxu0 %v4439_v0  ;;  %v644_v63 = vld [vmem:[#allocation7 + $0xd98] sm:$0xff] }
 0x25e   :  { %3927 = vmatprep.subr.bf16.mxu1 %v4441_v2  ;;  %v648_v0 = vld [vmem:[#allocation7 + $0xdb8] sm:$0xff]  ;;  %v4988_v2 = vld [vmem:[#allocation10] sm:$0xff] }
 0x25f   :  { %v3992_v42 = vrot.slane %v4988_v2, %v4887_v19  ;;  %v4496_v19 = vcombine.low %v644_v63, %v648_v0 }
 0x260   :  { %3764 = vmatpush1.bf16.msra.mxu0 %v4438_v9  ;;  %v4488_v9 = vcombine.low %v636_v24, %v640_v17  ;;  %v4513_v17 = vcombine.high %v660_v11, %v664_v6 }
 0x261   :  { %3928 = vmatpush1.bf16.msra.mxu1 %v4440_v10  ;;  %3774 = vmatprep.subr.bf16.mxu0 %v4447_v38  ;;  %v4495_v10 = vcombine.high %v643_v59, %v647_v60 }
 0x262   :  { %3938 = vmatprep.subr.bf16.mxu1 %v4449_v48  ;;  %v4497_v48 = vcombine.high %v644_v63, %v648_v0 }
 0x263   :  { %3766 = vmatmul.mubr.bf16.vlgmr.msra.gmra.mrb[4].mxu0 %v4957_v33 }
 0x264   :  { %3930 = vmatmul.mubr.bf16.vlgmr.msra.gmra.mrb[4].mxu1 %v4957_v33  ;;  %3775 = vmatpush1.bf16.msra.mxu0 %v4446_v5  ;;  %v4464_v33 = vcombine.low %v612_v49, %v616_v53  ;;  %v3996_v49 = vrot.slane %v4988_v2, %v4885_v18 }
 0x265   :  { %3806 = vmatprep.mubr.bf16.mxu0 %v4960_v37  ;;  %3939 = vmatpush1.bf16.msra.mxu1 %v4448_v44 }
 0x266   :  { %3970 = vmatprep.mubr.bf16.mxu1 %v4960_v37  ;;  %3776 = vmatprep.subr.bf16.mxu0 %v4455_v52  ;;  %v4470_v37 = vcombine.low %v619_v56, %v623_v57  ;;  %v652_v52 = vld [vmem:[#allocation7 + $0xdd8] sm:$0xff] }
 0x267   :  { %3940 = vmatprep.subr.bf16.mxu1 %v4457_v47  ;;  %v4505_v18 = vcombine.high %v652_v52, %v656_v45  ;;  %v4504_v16 = vcombine.low %v652_v52, %v656_v45 }
 0x268   :  { %3777 = vmatpush1.bf16.msra.mxu0 %v4454_v50 }
 0x269   :  { %3941 = vmatpush1.bf16.msra.mxu1 %v4456_v54  ;;  %3778 = vmatprep.subr.bf16.mxu0 %v4463_v55  ;;  %v4494_v54 = vcombine.low %v643_v59, %v647_v60 }
 0x26a   :  { %3942 = vmatprep.subr.bf16.mxu1 %v4465_v51 }
 0x26c   :  { %3779 = vmatpush1.bf16.msra.mxu0 %v4462_v1  ;;  %v4000_v1 = vrot.slane %v4988_v2, %v4891_v21 }
 0x26d   :  { %3943 = vmatpush1.bf16.msra.mxu1 %v4464_v33  ;;  %3780 = vmatprep.subr.bf16.mxu0 %v4471_v3 }
 0x26e   :  { %3944 = vmatprep.subr.bf16.mxu1 %v4473_v4  ;;  %v659_v4 = vld [vmem:[#allocation7 + $0xe10] sm:$0xff] }
 0x26f   :  { %v4511_v21 = vcombine.high %v659_v4, %v663_v7 }
 0x270   :  { %3781 = vmatpush1.bf16.msra.mxu0 %v4470_v37 }
 0x271   :  { %3945 = vmatpush1.bf16.msra.mxu1 %v4472_v12  ;;  %3782 = vmatprep.subr.bf16.mxu0 %v4479_v13  ;;  %v4004_v13 = vrot.slane %v4988_v2, %v4889_v20  ;;  %v4512_v20 = vcombine.low %v660_v11, %v664_v6  ;;  %v712_v11 = vld [vmem:[#allocation7 + $0xfb8] sm:$0xff] }
 0x272   :  { %3946 = vmatprep.subr.bf16.mxu1 %v4481_v14  ;;  %v4502_v14 = vcombine.low %v651_v39, %v655_v41  ;;  %v683_v41 = vld [vmem:[#allocation7 + $0xed0] sm:$0xff] }
 0x274   :  { %3783 = vmatpush1.bf16.msra.mxu0 %v4478_v28  ;;  %v667_v28 = vld [vmem:[#allocation7 + $0xe50] sm:$0xff] }
 0x275   :  { %3947 = vmatpush1.bf16.msra.mxu1 %v4480_v29  ;;  %3784 = vmatprep.subr.bf16.mxu0 %v4487_v30  ;;  %v671_v29 = vld [vmem:[#allocation7 + $0xe70] sm:$0xff]  ;;  %v668_v30 = vld [vmem:[#allocation7 + $0xe58] sm:$0xff] }
 0x276   :  { %v3480_v38 = vpop.f32.mrb[0].mxu0  ;;  %3948 = vmatprep.subr.bf16.mxu1 %v4489_v31  ;;  %v672_v31 = vld [vmem:[#allocation7 + $0xe78] sm:$0xff]  ;;  %v4519_v63 = vcombine.high %v667_v28, %v671_v29 }
 0x277   :  { %v4570_v5 = vadd.f32 %v3480_v38, %v726_v62  ;;  %v3644_v43 = vpop.f32.mrb[0].mxu1  ;;  %v3482_v44 = vpop.f32.mrb[1].mxu0  ;;  %v4510_v62 = vcombine.low %v659_v4, %v663_v7  ;;  %v4520_v38 = vcombine.low %v668_v30, %v672_v31  ;;  %v707_v4 = vld [vmem:[#allocation7 + $0xf90] sm:$0xff] }
 0x278   :  { %v4572_v46 = vadd.f32 %v3644_v43, %v734_v32  ;;  %v4571_v47 = vadd.f32 %v3482_v44, %v730_v34  ;;  %v3646_v53 = vpop.f32.mrb[1].mxu1  ;;  %v3484_v50 = vpop.f32.mrb[2].mxu0  ;;  %3785 = vmatpush1.bf16.msra.mxu0 %v4486_v35  ;;  %v4521_v32 = vcombine.high %v668_v30, %v672_v31  ;;  %v675_v34 = vld [vmem:[#allocation7 + $0xe90] sm:$0xff]  ;;  %v688_v43 = vld [vmem:[#allocation7 + $0xef8] sm:$0xff] }
 0x279   :  { %v3979_v55 = vmax.f32 %v4570_v5, 0.0  ;;  %v4573_v51 = vadd.f32 %v3646_v53, %v738_v36  ;;  %v3648_v56 = vpop.f32.mrb[2].mxu1  ;;  %3949 = vmatpush1.bf16.msra.mxu1 %v4488_v9  ;;  %v3485_v57 = vpop.f32.mrb[3].mxu0  ;;  %3786 = vmatprep.subr.bf16.mxu0 %v4495_v10  ;;  %v679_v35 = vld [vmem:[#allocation7 + $0xeb0] sm:$0xff]  ;;  %v676_v36 = vld [vmem:[#allocation7 + $0xe98] sm:$0xff]  ;;  %v4518_v10 = vcombine.low %v667_v28, %v671_v29 }
 0x27a   :  { %v3981_v61 = vmax.f32 %v4572_v46, 0.0  ;;  %v3980_v33 = vmax.f32 %v4571_v47, 0.0  ;;  %v3649_v3 = vpop.f32.mrb[3].mxu1  ;;  %3950 = vmatprep.subr.bf16.mxu1 %v4497_v48  ;;  %v680_v9 = vld [vmem:[#allocation7 + $0xeb8] sm:$0xff]  ;;  %v4527_v48 = vcombine.high %v675_v34, %v679_v35  ;;  %v687_v5 = vld [vmem:[#allocation7 + $0xef0] sm:$0xff]  ;;  %v4526_v44 = vcombine.low %v675_v34, %v679_v35 }
 0x27b   :  { %v4029_v8 = vmul.f32 %v3992_v42, %v3979_v55  ;;  %v3982_v12 = vmax.f32 %v4573_v51, 0.0  ;;  %v4529_v39 = vcombine.high %v676_v36, %v680_v9  ;;  %v684_v42 = vld [vmem:[#allocation7 + $0xed8] sm:$0xff]  ;;  %v4528_v52 = vcombine.low %v676_v36, %v680_v9  ;;  %v691_v47 = vld [vmem:[#allocation7 + $0xf10] sm:$0xff] }
 0x27c   :  { %v4030_v37 = vmul.f32 %v3996_v49, %v3980_v33  ;;  %3787 = vmatpush1.bf16.msra.mxu0 %v4494_v54  ;;  %v4031_v22 = vmul.f32 %v4000_v1, %v3981_v61  ;;  %v4535_v45 = vcombine.high %v683_v41, %v687_v5  ;;  %v4537_v46 = vcombine.high %v684_v42, %v688_v43  ;;  %v695_v49 = vld [vmem:[#allocation7 + $0xf30] sm:$0xff]  ;;  %v692_v53 = vld [vmem:[#allocation7 + $0xf18] sm:$0xff] }
 0x27d   :  { %3951 = vmatpush1.bf16.msra.mxu1 %v4496_v19  ;;  %3788 = vmatprep.subr.bf16.mxu0 %v4503_v58  ;;  %v4032_v59 = vmul.f32 %v4004_v13, %v3982_v12  ;;  %v696_v50 = vld [vmem:[#allocation7 + $0xf38] sm:$0xff]  ;;  %v4534_v54 = vcombine.low %v683_v41, %v687_v5  ;;  %v4536_v55 = vcombine.low %v684_v42, %v688_v43  ;;  %v699_v57 = vld [vmem:[#allocation7 + $0xf50] sm:$0xff] }
 0x27e   :  { %v4037_v24 = vadd.f32 %v4030_v37, %v4029_v8  ;;  %3952 = vmatprep.subr.bf16.mxu1 %v4505_v18  ;;  %v4543_v51 = vcombine.high %v691_v47, %v695_v49  ;;  %v4545_v56 = vcombine.high %v692_v53, %v696_v50  ;;  %v703_v19 = vld [vmem:[#allocation7 + $0xf70] sm:$0xff]  ;;  %v700_v58 = vld [vmem:[#allocation7 + $0xf58] sm:$0xff]  ;;  %v4542_v1 = vcombine.low %v691_v47, %v695_v49 }
 0x27f   :  { %v704_v61 = vld [vmem:[#allocation7 + $0xf78] sm:$0xff]  ;;  %v4544_v33 = vcombine.low %v692_v53, %v696_v50  ;;  %v4551_v3 = vcombine.high %v699_v57, %v703_v19  ;;  %v711_v7 = vld [vmem:[#allocation7 + $0xfb0] sm:$0xff]  ;;  %v4550_v6 = vcombine.low %v699_v57, %v703_v19  ;;  %v4008_v34 = vrot.slane %v4988_v2, %v4895_v25 }
 0x280   :  { %v4038_v60 = vadd.f32 %v4037_v24, %v4031_v22  ;;  %3789 = vmatpush1.bf16.msra.mxu0 %v4502_v14  ;;  %v4553_v18 = vcombine.high %v700_v58, %v704_v61  ;;  %v708_v8 = vld [vmem:[#allocation7 + $0xf98] sm:$0xff]  ;;  %v4552_v37 = vcombine.low %v700_v58, %v704_v61  ;;  %v4559_v12 = vcombine.high %v707_v4, %v711_v7  ;;  %v715_v14 = vld [vmem:[#allocation7 + $0xfd0] sm:$0xff] }
 0x281   :  { %3953 = vmatpush1.bf16.msra.mxu1 %v4504_v16  ;;  %3790 = vmatprep.subr.bf16.mxu0 %v4511_v21  ;;  %v4561_v13 = vcombine.high %v708_v8, %v712_v11  ;;  %v719_v16 = vld [vmem:[#allocation7 + $0xff0] sm:$0xff]  ;;  %v716_v21 = vld [vmem:[#allocation7 + $0xfd8] sm:$0xff]  ;;  %v4558_v24 = vcombine.low %v707_v4, %v711_v7 }
 0x282   :  { %v5004_v0 = vadd.f32 %v4038_v60, %v4032_v59  ;;  %3954 = vmatprep.subr.bf16.mxu1 %v4513_v17  ;;  %v720_v22 = vld [vmem:[#allocation7 + $0xff8] sm:$0xff]  ;;  %v4560_v17 = vcombine.low %v708_v8, %v712_v11  ;;  %v4567_v28 = vcombine.high %v715_v14, %v719_v16  ;;  %v4566_v30 = vcombine.low %v715_v14, %v719_v16 }
 0x283   :  { %v4569_v29 = vcombine.high %v716_v21, %v720_v22  ;;  %v4568_v31 = vcombine.low %v716_v21, %v720_v22  ;;  %v742_v59 = vrot.slane %v4984_v27, %v4895_v25  ;;  %v750_v60 = vrot.slane %v4984_v27, %v4911_v40 }
 0x284   :  { %3791 = vmatpush1.bf16.msra.mxu0 %v4510_v62  ;;  %v746_v62 = vrot.slane %v4984_v27, %v4893_v23  ;;  %v4016_v25 = vrot.slane %v4988_v2, %v4911_v40 }
 0x285   :  { %3955 = vmatpush1.bf16.msra.mxu1 %v4512_v20  ;;  %3792 = vmatprep.subr.bf16.mxu0 %v4519_v63  ;;  %v754_v20 = vrot.slane %v4984_v27, %v4897_v26 }
 0x286   :  { %3956 = vmatprep.subr.bf16.mxu1 %v4521_v32 }
 0x288   :  { %3793 = vmatpush1.bf16.msra.mxu0 %v4518_v10  ;;  %v4012_v10 = vrot.slane %v4988_v2, %v4893_v23  ;;  %v4020_v23 = vrot.slane %v4988_v2, %v4897_v26 }
 0x289   :  { %3957 = vmatpush1.bf16.msra.mxu1 %v4520_v38  ;;  %3794 = vmatprep.subr.bf16.mxu0 %v4527_v48 }
 0x28a   :  { %3958 = vmatprep.subr.bf16.mxu1 %v4529_v39 }
 0x28c   :  { %3795 = vmatpush1.bf16.msra.mxu0 %v4526_v44 }
 0x28d   :  { %3959 = vmatpush1.bf16.msra.mxu1 %v4528_v52  ;;  %3796 = vmatprep.subr.bf16.mxu0 %v4535_v45 }
 0x28e   :  { %3960 = vmatprep.subr.bf16.mxu1 %v4537_v46 }
 0x290   :  { %3797 = vmatpush1.bf16.msra.mxu0 %v4534_v54 }
 0x291   :  { %3961 = vmatpush1.bf16.msra.mxu1 %v4536_v55  ;;  %3798 = vmatprep.subr.bf16.mxu0 %v4543_v51  ;;  %v4047_v51 = vstv %s5037_s6 }
 0x292   :  { %3962 = vmatprep.subr.bf16.mxu1 %v4545_v56 }
 0x294   :  { %3799 = vmatpush1.bf16.msra.mxu0 %v4542_v1 }
 0x295   :  { %3963 = vmatpush1.bf16.msra.mxu1 %v4544_v33  ;;  %3800 = vmatprep.subr.bf16.mxu0 %v4551_v3 }
 0x296   :  { %3964 = vmatprep.subr.bf16.mxu1 %v4553_v18 }
 0x298   :  { %3801 = vmatpush1.bf16.msra.mxu0 %v4550_v6 }
 0x299   :  { %3965 = vmatpush1.bf16.msra.mxu1 %v4552_v37  ;;  %3802 = vmatprep.subr.bf16.mxu0 %v4559_v12 }
 0x29a   :  { %3966 = vmatprep.subr.bf16.mxu1 %v4561_v13 }
 0x29c   :  { %3803 = vmatpush1.bf16.msra.mxu0 %v4558_v24 }
 0x29d   :  { %3967 = vmatpush1.bf16.msra.mxu1 %v4560_v17  ;;  %3804 = vmatprep.subr.bf16.mxu0 %v4567_v28 }
 0x29e   :  { %3968 = vmatprep.subr.bf16.mxu1 %v4569_v29 }
 0x2a0   :  { %3805 = vmatpush1.bf16.msra.mxu0 %v4566_v30 }
 0x2a1   :  { %3969 = vmatpush1.bf16.msra.mxu1 %v4568_v31 }
 0x2a3   :  { %3807 = vmatmul.mubr.bf16.vlgmr.msra.gmra.mrb[4].mxu0 %v4966_v15 }
 0x2a4   :  { %3971 = vmatmul.mubr.bf16.vlgmr.msra.gmra.mrb[4].mxu1 %v4966_v15 }
 0x376   :  { %v3808_v63 = vpop.f32.mrb[4].mxu0 }
 0x377   :  { %v4574_v32 = vadd.f32 %v3808_v63, %v742_v59  ;;  %v3972_v35 = vpop.f32.mrb[4].mxu1  ;;  %v3810_v36 = vpop.f32.mrb[5].mxu0 }
 0x378   :  { %v4576_v15 = vadd.f32 %v3972_v35, %v750_v60  ;;  %v4575_v9 = vadd.f32 %v3810_v36, %v746_v62  ;;  %v3974_v38 = vpop.f32.mrb[5].mxu1  ;;  %v3812_v48 = vpop.f32.mrb[6].mxu0 }
 0x379   :  { %v3983_v39 = vmax.f32 %v4574_v32, 0.0  ;;  %v4577_v41 = vadd.f32 %v3974_v38, %v754_v20  ;;  %v3976_v5 = vpop.f32.mrb[6].mxu1  ;;  %v3813_v42 = vpop.f32.mrb[7].mxu0 }
 0x37a   :  { %v3984_v43 = vmax.f32 %v4575_v9, 0.0  ;;  %v3977_v27 = vpop.f32.mrb[7].mxu1  ;;  %v3985_v52 = vmax.f32 %v4576_v15, 0.0 }
 0x37b   :  { %v4033_v44 = vmul.f32 %v4008_v34, %v3983_v39  ;;  %v3986_v47 = vmax.f32 %v4577_v41, 0.0 }
 0x37c   :  { %v4034_v45 = vmul.f32 %v4012_v10, %v3984_v43  ;;  %v4035_v49 = vmul.f32 %v4016_v25, %v3985_v52 }
 0x37d   :  { %v4040_v46 = vadd.f32 %v5004_v0, %v4033_v44  ;;  %v4036_v50 = vmul.f32 %v4020_v23, %v3986_v47 }
 0x37f   :  { %v4041_v53 = vadd.f32 %v4040_v46, %v4034_v45 }
 0x381   :  { %v4042_v54 = vadd.f32 %v4041_v53, %v4035_v49 }
 0x383   :  { %v4043_v55 = vadd.f32 %v4042_v54, %v4036_v50 }
 0x385   :  { %4044 = vadd.xlane.f32.xlu0 %v4043_v55 }
 0x412   :  { %v4045_v56 = vpop.xlane.xlu0 %4044 }
 0x413   :  { %v4048_v40 = vadd.f32 %v4047_v51, %v4045_v56 }
 0x415   :  { %4050 = vst.msk [vmem:[%s5038_s7] sm:$0xff] %vm4049_vm0, %v4048_v40 }
 0x416   :  { %4055 = vsyncpa [#allocation4], 1 }
 0x417   :  { %4056 = vsyncpa [#allocation6], 1 }
 0x418   :  { %4057 = vsyncpa [#allocation9], 1 }

</bundles_post_ra>
